<compile_context>
chip_gen: v7x
topology: tpu7x:2x2x1
jax: 0.10.0
libtpu: 0.0.40
codegen_flags: <defaults>
</compile_context>

<pallas_src>
import math
import jax
import jax.numpy as jnp
import numpy as np
from jax.experimental import pallas as pl
from jax.experimental.pallas import tpu as pltpu

D_MODEL = 32
NUM_HEADS = 4
D_FF = 64
D_K = D_MODEL // NUM_HEADS
LN_EPS = 1e-5
LANE = 128
NEG_INF = -1e30          # large finite negative for additive masking (avoids -inf -> NaN)
MXU_DTYPE = jnp.bfloat16 # MXU-operand dtype (v5e/v6e/v7x are bf16-native)

# Row offsets of the packed weight slab (all multiples of 8 -> free sublane views).
_ROW_QKV1 = 0            # [Wq*scale | Wk | Wv]  (32, 96)
_ROW_O1 = 32             # W_o self               (32, 32)
_ROW_Q2 = 64             # Wq*scale cross         (32, 32)
_ROW_KV2 = 96            # [Wk | Wv] cross        (32, 64)
_ROW_O2 = 128            # W_o cross              (32, 32)
_ROW_FF1 = 160           # FFN linear1            (32, 64)
_ROW_FF2 = 192           # FFN linear2            (64, 32)
_W_ROWS = 256


# ---------------- in-kernel math helpers -------------------------------------------------------
def _layer_norm(v, g, b):
    # One-pass variance: E[x^2] - E[x]^2 -> the two reductions are independent (not chained).
    m = jnp.mean(v, axis=-1, keepdims=True)
    m2 = jnp.mean(v * v, axis=-1, keepdims=True)
    var = m2 - m * m
    return (v - m) * jax.lax.rsqrt(var + LN_EPS) * g + b


def _split_heads(t, base):
    # (N, >=base+D) f32 -> (H, N, D_K); lane extraction only (no sublane movement).
    return jnp.stack(
        [t[:, base + h * D_K: base + (h + 1) * D_K] for h in range(NUM_HEADS)], axis=0)


def _mha(qh, kh, vh, w_o, b_o, bias):
    # qh: (H, Nq, D_K) pre-scaled queries (scale folded into W_q); kh/vh: (H, Nk, D_K);
    # w_o: (D, D) bf16; bias: (Nq, Nk) additive mask. All matmuls head-batched on the MXU
    # with f32 accumulation; softmax elementwise math stays f32.
    qh = qh.astype(MXU_DTYPE)
    kh = kh.astype(MXU_DTYPE)
    vh = vh.astype(MXU_DTYPE)
    s = jnp.einsum('hnd,hmd->hnm', qh, kh, preferred_element_type=jnp.float32)
    s = s + bias[None]
    s = s - jnp.max(s, axis=-1, keepdims=True)
    p = jnp.exp(s)
    p = p * pl.reciprocal(jnp.sum(p, axis=-1, keepdims=True), approx=True)
    oh = jnp.einsum('hnm,hmd->hnd', p.astype(MXU_DTYPE), vh,
                    preferred_element_type=jnp.float32)
    # Head outputs are pushed straight through the (head-split) output projection and
    # summed over heads -> no lane-wise concat of per-head results.
    w_oh = w_o.reshape(NUM_HEADS, D_K, D_MODEL)
    proj = jnp.einsum('hnd,hde->hne', oh.astype(MXU_DTYPE), w_oh,
                      preferred_element_type=jnp.float32)
    return jnp.sum(proj, axis=0) + b_o


# ---------------- Pallas kernel: one batch element per grid step -------------------------------
def _make_kernel(tq, tk):
    def kernel(xe_ref, sbias_ref, cbias_ref, w_ref, vec_ref, out_ref):
        xe = xe_ref[...]                   # (tq + tk, D) f32
        x = xe[:tq, :]                     # decoder state
        enc = xe[tq:, :]                   # encoder output
        self_bias = sbias_ref[...]         # (tq, tq) additive
        cross_bias = cbias_ref[...]        # (tq, tk) additive

        # Packed-weight views (bf16); row starts are multiples of 8 -> free views.
        w_qkv1 = w_ref[_ROW_QKV1:_ROW_QKV1 + D_MODEL, 0:3 * D_MODEL]
        w_o1 = w_ref[_ROW_O1:_ROW_O1 + D_MODEL, 0:D_MODEL]
        w_q2 = w_ref[_ROW_Q2:_ROW_Q2 + D_MODEL, 0:D_MODEL]
        w_kv2 = w_ref[_ROW_KV2:_ROW_KV2 + D_MODEL, 0:2 * D_MODEL]
        w_o2 = w_ref[_ROW_O2:_ROW_O2 + D_MODEL, 0:D_MODEL]
        w_ff1 = w_ref[_ROW_FF1:_ROW_FF1 + D_MODEL, 0:D_FF]
        w_ff2 = w_ref[_ROW_FF2:_ROW_FF2 + D_FF, 0:D_MODEL]

        # Bias / LayerNorm rows (f32).
        b_qkv1 = vec_ref[0:1, 0:3 * D_MODEL]
        b_o1 = vec_ref[1:2, 0:D_MODEL]
        b_q2 = vec_ref[2:3, 0:D_MODEL]
        b_kv2 = vec_ref[3:4, 0:2 * D_MODEL]
        b_o2 = vec_ref[4:5, 0:D_MODEL]
        b_ff1 = vec_ref[5:6, 0:D_FF]
        b_ff2 = vec_ref[6:7, 0:D_MODEL]
        g1, be1 = vec_ref[7:8, 0:D_MODEL], vec_ref[8:9, 0:D_MODEL]
        g2, be2 = vec_ref[9:10, 0:D_MODEL], vec_ref[10:11, 0:D_MODEL]
        g3, be3 = vec_ref[11:12, 0:D_MODEL], vec_ref[12:13, 0:D_MODEL]

        # ---- self attention (fused Q|K|V projection; 1/sqrt(d_k) folded into W_q) ----
        qkv = jnp.dot(x.astype(MXU_DTYPE), w_qkv1,
                      preferred_element_type=jnp.float32) + b_qkv1
        sa = _mha(_split_heads(qkv, 0),
                  _split_heads(qkv, D_MODEL),
                  _split_heads(qkv, 2 * D_MODEL),
                  w_o1, b_o1, self_bias)
        h = _layer_norm(x + sa, g1, be1)

        # ---- cross attention (Q from decoder state, fused K|V from encoder output) ----
        q2 = jnp.dot(h.astype(MXU_DTYPE), w_q2,
                     preferred_element_type=jnp.float32) + b_q2
        kv2 = jnp.dot(enc.astype(MXU_DTYPE), w_kv2,
                      preferred_element_type=jnp.float32) + b_kv2
        ca = _mha(_split_heads(q2, 0),
                  _split_heads(kv2, 0),
                  _split_heads(kv2, D_MODEL),
                  w_o2, b_o2, cross_bias)
        h = _layer_norm(h + ca, g2, be2)

        # ---- feed forward ----
        ff = jnp.maximum(jnp.dot(h.astype(MXU_DTYPE), w_ff1,
                                 preferred_element_type=jnp.float32) + b_ff1, 0.0)
        ff = jnp.dot(ff.astype(MXU_DTYPE), w_ff2,
                     preferred_element_type=jnp.float32) + b_ff2
        out_ref[...] = _layer_norm(h + ff, g3, be3)

    return kernel


# ---------------- host-side packing of the 26 parameter tensors --------------------------------
def pack_params(params):
    (wq1, bq1, wk1, bk1, wv1, bv1, wo1, bo1,
     wq2, bq2, wk2, bk2, wv2, bv2, wo2, bo2,
     w1, b1, w2, b2, g1, be1, g2, be2, g3, be3) = params
    scale = 1.0 / math.sqrt(D_K)

    def block(*mats):
        m = jnp.concatenate([jnp.asarray(a, jnp.float32) for a in mats], axis=1)
        return jnp.pad(m, ((0, 0), (0, LANE - m.shape[1])))

    w_all = jnp.concatenate([
        block(wq1 * scale, wk1, wv1),   # rows   0: 32  fused self-attn QKV (scale folded)
        block(wo1),                     # rows  32: 64  self-attn out proj
        block(wq2 * scale),             # rows  64: 96  cross-attn Q (scale folded)
        block(wk2, wv2),                # rows  96:128  fused cross-attn KV
        block(wo2),                     # rows 128:160  cross-attn out proj
        block(w1),                      # rows 160:192  FFN linear1
        block(w2),                      # rows 192:256  FFN linear2
    ], axis=0).astype(MXU_DTYPE)        # (256, 128) bf16

    def vrow(*parts):
        v = jnp.concatenate([jnp.asarray(p, jnp.float32).reshape(-1) for p in parts])
        return jnp.pad(v, (0, LANE - v.shape[0]))

    zero = jnp.zeros((D_MODEL,), jnp.float32)
    vec = jnp.stack([
        vrow(bq1 * scale, bk1, bv1),    # 0 fused self-attn QKV bias
        vrow(bo1),                      # 1
        vrow(bq2 * scale),              # 2
        vrow(bk2, bv2),                 # 3
        vrow(bo2),                      # 4
        vrow(b1),                       # 5
        vrow(b2),                       # 6
        vrow(g1), vrow(be1),            # 7, 8   norm1
        vrow(g2), vrow(be2),            # 9, 10  norm2
        vrow(g3), vrow(be3),            # 11, 12 norm3
        vrow(zero), vrow(zero), vrow(zero),   # pad to 16 rows (sublane multiple)
    ])                                  # (16, 128) f32
    return w_all, vec


def _mask_to_bias(mask, B, tq, tk):
    """Additive bias (B, tq, tk): 0 where attended, NEG_INF where mask == 0."""
    if mask is None:
        return jnp.zeros((B, tq, tk), jnp.float32)
    m = jnp.asarray(mask, jnp.float32)
    if m.ndim == 4:
        # (B|1, 1|H, tq, tk): collapse the head dim.
        # TODO(synk): per-head masks (distinct slices along dim 1) are not supported.
        m = m[:, 0, :, :]
    m = jnp.broadcast_to(m, (B, tq, tk))
    return jnp.where(m != 0.0, 0.0, NEG_INF).astype(jnp.float32)


# ---------------- wrapper ----------------------------------------------------------------------
def decoder_layer(x, enc_out, params, src_mask=None, tgt_mask=None):
    B, Tq, D = x.shape
    _, Tk, _ = enc_out.shape

    # Single activation input: [x | enc_out] stacked along the sequence axis per batch.
    xe = jnp.concatenate([jnp.asarray(x, jnp.float32),
                          jnp.asarray(enc_out, jnp.float32)], axis=1)
    xe_flat = xe.reshape(B * (Tq + Tk), D)

    self_bias = _mask_to_bias(tgt_mask, B, Tq, Tq).reshape(B * Tq, Tq)
    cross_bias = _mask_to_bias(src_mask, B, Tq, Tk).reshape(B * Tq, Tk)

    w_all, vec = pack_params(params)

    grid_spec = pltpu.PrefetchScalarGridSpec(
        num_scalar_prefetch=0,
        grid=(B,),
        in_specs=[
            pl.BlockSpec((Tq + Tk, D), lambda b: (b, 0)),      # per-batch activations
            pl.BlockSpec((Tq, Tq), lambda b: (b, 0)),          # per-batch self-attn bias
            pl.BlockSpec((Tq, Tk), lambda b: (b, 0)),          # per-batch cross-attn bias
            pl.BlockSpec((_W_ROWS, LANE), lambda b: (0, 0)),   # packed weights (resident)
            pl.BlockSpec((16, LANE), lambda b: (0, 0)),        # biases / LN params (resident)
        ],
        out_specs=pl.BlockSpec((Tq, D), lambda b: (b, 0)),
    )

    out_flat = pl.pallas_call(
        _make_kernel(Tq, Tk),
        out_shape=jax.ShapeDtypeStruct((B * Tq, D), jnp.float32),
        grid_spec=grid_spec,
        compiler_params=pltpu.CompilerParams(
            dimension_semantics=("parallel",),       # batch axis -> both TCs on v7x
            vmem_limit_bytes=32 * 1024 * 1024,
        ),
    )(xe_flat, self_bias, cross_bias, w_all, vec)
    return out_flat.reshape(B, Tq, D)


# ---------------- deterministic parameter init -------------------------------------------------
def init_params(key):
    def lin(k, din, dout):
        bound = 1.0 / math.sqrt(din)
        k1, k2 = jax.random.split(k)
        w = jax.random.uniform(k1, (din, dout), jnp.float32, -bound, bound)
        b = jax.random.uniform(k2, (1, dout), jnp.float32, -bound, bound)
        return w, b

    keys = iter(jax.random.split(key, 10))
    params = []
    for _ in range(4):                                   # self-attn W_q, W_k, W_v, fc_out
        w, b = lin(next(keys), D_MODEL, D_MODEL); params += [w, b]
    for _ in range(4):                                   # cross-attn W_q, W_k, W_v, fc_out
        w, b = lin(next(keys), D_MODEL, D_MODEL); params += [w, b]
    w, b = lin(next(keys), D_MODEL, D_FF); params += [w, b]   # ff.linear1
    w, b = lin(next(keys), D_FF, D_MODEL); params += [w, b]   # ff.linear2
    for _ in range(3):                                   # norm1..norm3 (gamma, beta)
        params += [jnp.ones((1, D_MODEL), jnp.float32),
                   jnp.zeros((1, D_MODEL), jnp.float32)]
    return params


# ---------------- pure-JAX f32 reference (original module math, per batch element) -------------
def _ref_layer_norm(v, g, b):
    mean = jnp.mean(v, axis=-1, keepdims=True)
    var = jnp.mean((v - mean) ** 2, axis=-1, keepdims=True)
    return (v - mean) * jax.lax.rsqrt(var + LN_EPS) * g + b


def _ref_mha(q_in, kv_in, wq, bq, wk, bk, wv, bv, wo, bo, mask):
    Q = jnp.dot(q_in, wq) + bq
    K = jnp.dot(kv_in, wk) + bk
    V = jnp.dot(kv_in, wv) + bv
    scale = 1.0 / math.sqrt(D_K)
    outs = []
    for h in range(NUM_HEADS):
        lo = h * D_K
        s = jnp.dot(Q[:, lo:lo + D_K], K[:, lo:lo + D_K].T) * scale
        s = jnp.where(mask == 0.0, -jnp.inf, s)
        p = jax.nn.softmax(s, axis=-1)
        outs.append(jnp.dot(p, V[:, lo:lo + D_K]))
    return jnp.dot(jnp.concatenate(outs, axis=-1), wo) + bo


def ref_single(x, enc, tgt_m, src_m, params):
    (wq1, bq1, wk1, bk1, wv1, bv1, wo1, bo1,
     wq2, bq2, wk2, bk2, wv2, bv2, wo2, bo2,
     w1, b1, w2, b2, g1, be1, g2, be2, g3, be3) = params
    sa = _ref_mha(x, x, wq1, bq1, wk1, bk1, wv1, bv1, wo1, bo1, tgt_m)
    h = _ref_layer_norm(x + sa, g1, be1)
    ca = _ref_mha(h, enc, wq2, bq2, wk2, bk2, wv2, bv2, wo2, bo2, src_m)
    h = _ref_layer_norm(h + ca, g2, be2)
    ff = jnp.dot(jnp.maximum(jnp.dot(h, w1) + b1, 0.0), w2) + b2
    return _ref_layer_norm(h + ff, g3, be3)


if __name__ == "__main__":
    key = jax.random.PRNGKey(0)
    kx, ke, kp = jax.random.split(key, 3)
    B, Tq, Tk = 2, 8, 8
    x = jax.random.normal(kx, (B, Tq, D_MODEL), jnp.float32)
    enc_out = jax.random.normal(ke, (B, Tk, D_MODEL), jnp.float32)
    params = init_params(kp)
    tgt_mask = jnp.tril(jnp.ones((Tq, Tq), jnp.float32))   # causal decoder mask

    out = decoder_layer(x, enc_out, params, src_mask=None, tgt_mask=tgt_mask)
    out = jax.block_until_ready(out)

    src_m = jnp.ones((Tq, Tk), jnp.float32)
    ref = jnp.stack([ref_single(x[b], enc_out[b], tgt_mask, src_m, params)
                     for b in range(B)])
    err = float(np.abs(np.asarray(out) - np.asarray(ref)).max())
    # Tolerance accounts for bf16 MXU operands (f32 accumulation), the approx softmax
    # reciprocal, and host-side folding of 1/sqrt(d_k) into W_q.
    assert np.allclose(np.asarray(out), np.asarray(ref), atol=6e-2, rtol=6e-2), \
        f"max err {err}"
    print("KERNEL_OK")
</pallas_src>

<mosaic_0001>
module attributes {stable_mosaic.version = 11 : i64} {
  func.func @kernel(%arg0: i32, %arg1: memref<16x32xf32, #tpu.memory_space<vmem>>, %arg2: memref<8x8xf32, #tpu.memory_space<vmem>>, %arg3: memref<8x8xf32, #tpu.memory_space<vmem>>, %arg4: memref<256x128xbf16, #tpu.memory_space<vmem>>, %arg5: memref<16x128xf32, #tpu.memory_space<vmem>>, %arg6: memref<8x32xf32, #tpu.memory_space<vmem>>) attributes {dimension_semantics = [#tpu.dimension_semantics<parallel>], iteration_bounds = array<i64: 2>, scalar_prefetch = 0 : i64, scratch_operands = 0 : i64, tpu.core_type = #tpu.core_type<tc>, window_params = [{transform_indices = @transform_0, window_bounds = array<i64: 16, 32>}, {transform_indices = @transform_1, window_bounds = array<i64: 8, 8>}, {transform_indices = @transform_2, window_bounds = array<i64: 8, 8>}, {pipeline_mode = #tpu.pipeline_mode<synchronous>, transform_indices = @transform_3, window_bounds = array<i64: 256, 128>}, {pipeline_mode = #tpu.pipeline_mode<synchronous>, transform_indices = @transform_4, window_bounds = array<i64: 16, 128>}, {transform_indices = @transform_5, window_bounds = array<i64: 8, 32>}]} {
    %c0 = arith.constant 0 : index
    %c0_0 = arith.constant 0 : index
    %0 = vector.load %arg1[%c0, %c0_0] : memref<16x32xf32, #tpu.memory_space<vmem>>, vector<16x32xf32>
    %1 = vector.extract_strided_slice %0 {offsets = [0, 0], sizes = [8, 32], strides = [1, 1]} : vector<16x32xf32> to vector<8x32xf32>
    %2 = vector.extract_strided_slice %0 {offsets = [8, 0], sizes = [8, 32], strides = [1, 1]} : vector<16x32xf32> to vector<8x32xf32>
    %c0_1 = arith.constant 0 : index
    %c0_2 = arith.constant 0 : index
    %3 = vector.load %arg2[%c0_1, %c0_2] : memref<8x8xf32, #tpu.memory_space<vmem>>, vector<8x8xf32>
    %c0_3 = arith.constant 0 : index
    %c0_4 = arith.constant 0 : index
    %4 = vector.load %arg3[%c0_3, %c0_4] : memref<8x8xf32, #tpu.memory_space<vmem>>, vector<8x8xf32>
    %c0_5 = arith.constant 0 : index
    %c0_6 = arith.constant 0 : index
    %5 = vector.load %arg4[%c0_5, %c0_6] : memref<256x128xbf16, #tpu.memory_space<vmem>>, vector<32x96xbf16>
    %c32 = arith.constant 32 : index
    %c0_7 = arith.constant 0 : index
    %6 = vector.load %arg4[%c32, %c0_7] : memref<256x128xbf16, #tpu.memory_space<vmem>>, vector<32x32xbf16>
    %c64 = arith.constant 64 : index
    %c0_8 = arith.constant 0 : index
    %7 = vector.load %arg4[%c64, %c0_8] : memref<256x128xbf16, #tpu.memory_space<vmem>>, vector<32x32xbf16>
    %c96 = arith.constant 96 : index
    %c0_9 = arith.constant 0 : index
    %8 = vector.load %arg4[%c96, %c0_9] : memref<256x128xbf16, #tpu.memory_space<vmem>>, vector<32x64xbf16>
    %c128 = arith.constant 128 : index
    %c0_10 = arith.constant 0 : index
    %9 = vector.load %arg4[%c128, %c0_10] : memref<256x128xbf16, #tpu.memory_space<vmem>>, vector<32x32xbf16>
    %c160 = arith.constant 160 : index
    %c0_11 = arith.constant 0 : index
    %10 = vector.load %arg4[%c160, %c0_11] : memref<256x128xbf16, #tpu.memory_space<vmem>>, vector<32x64xbf16>
    %c192 = arith.constant 192 : index
    %c0_12 = arith.constant 0 : index
    %11 = vector.load %arg4[%c192, %c0_12] : memref<256x128xbf16, #tpu.memory_space<vmem>>, vector<64x32xbf16>
    %c0_13 = arith.constant 0 : index
    %c0_14 = arith.constant 0 : index
    %12 = vector.load %arg5[%c0_13, %c0_14] : memref<16x128xf32, #tpu.memory_space<vmem>>, vector<1x96xf32>
    %c1 = arith.constant 1 : index
    %c0_15 = arith.constant 0 : index
    %13 = vector.load %arg5[%c1, %c0_15] : memref<16x128xf32, #tpu.memory_space<vmem>>, vector<1x32xf32>
    %c2 = arith.constant 2 : index
    %c0_16 = arith.constant 0 : index
    %14 = vector.load %arg5[%c2, %c0_16] : memref<16x128xf32, #tpu.memory_space<vmem>>, vector<1x32xf32>
    %c3 = arith.constant 3 : index
    %c0_17 = arith.constant 0 : index
    %15 = vector.load %arg5[%c3, %c0_17] : memref<16x128xf32, #tpu.memory_space<vmem>>, vector<1x64xf32>
    %c4 = arith.constant 4 : index
    %c0_18 = arith.constant 0 : index
    %16 = vector.load %arg5[%c4, %c0_18] : memref<16x128xf32, #tpu.memory_space<vmem>>, vector<1x32xf32>
    %c5 = arith.constant 5 : index
    %c0_19 = arith.constant 0 : index
    %17 = vector.load %arg5[%c5, %c0_19] : memref<16x128xf32, #tpu.memory_space<vmem>>, vector<1x64xf32>
    %c6 = arith.constant 6 : index
    %c0_20 = arith.constant 0 : index
    %18 = vector.load %arg5[%c6, %c0_20] : memref<16x128xf32, #tpu.memory_space<vmem>>, vector<1x32xf32>
    %c7 = arith.constant 7 : index
    %c0_21 = arith.constant 0 : index
    %19 = vector.load %arg5[%c7, %c0_21] : memref<16x128xf32, #tpu.memory_space<vmem>>, vector<1x32xf32>
    %c8 = arith.constant 8 : index
    %c0_22 = arith.constant 0 : index
    %20 = vector.load %arg5[%c8, %c0_22] : memref<16x128xf32, #tpu.memory_space<vmem>>, vector<1x32xf32>
    %c9 = arith.constant 9 : index
    %c0_23 = arith.constant 0 : index
    %21 = vector.load %arg5[%c9, %c0_23] : memref<16x128xf32, #tpu.memory_space<vmem>>, vector<1x32xf32>
    %c10 = arith.constant 10 : index
    %c0_24 = arith.constant 0 : index
    %22 = vector.load %arg5[%c10, %c0_24] : memref<16x128xf32, #tpu.memory_space<vmem>>, vector<1x32xf32>
    %c11 = arith.constant 11 : index
    %c0_25 = arith.constant 0 : index
    %23 = vector.load %arg5[%c11, %c0_25] : memref<16x128xf32, #tpu.memory_space<vmem>>, vector<1x32xf32>
    %c12 = arith.constant 12 : index
    %c0_26 = arith.constant 0 : index
    %24 = vector.load %arg5[%c12, %c0_26] : memref<16x128xf32, #tpu.memory_space<vmem>>, vector<1x32xf32>
    %25 = arith.truncf %1 : vector<8x32xf32> to vector<8x32xbf16>
    %cst = arith.constant dense<0.000000e+00> : vector<8x96xf32>
    %26 = tpu.matmul %25, %5, %cst {dimension_numbers = #tpu.dot_dimension_numbers<[1], [0], [0], [1], [0, 0, 1, 1], [], []>} : vector<8x32xbf16>, vector<32x96xbf16>, vector<8x96xf32> -> vector<8x96xf32>
    %27 = vector.broadcast %12 : vector<1x96xf32> to vector<8x96xf32>
    %28 = arith.addf %26, %27 : vector<8x96xf32>
    %29 = vector.extract_strided_slice %28 {offsets = [0, 0], sizes = [8, 8], strides = [1, 1]} : vector<8x96xf32> to vector<8x8xf32>
    %30 = vector.extract_strided_slice %28 {offsets = [0, 8], sizes = [8, 8], strides = [1, 1]} : vector<8x96xf32> to vector<8x8xf32>
    %31 = vector.extract_strided_slice %28 {offsets = [0, 16], sizes = [8, 8], strides = [1, 1]} : vector<8x96xf32> to vector<8x8xf32>
    %32 = vector.extract_strided_slice %28 {offsets = [0, 24], sizes = [8, 8], strides = [1, 1]} : vector<8x96xf32> to vector<8x8xf32>
    %33 = vector.shape_cast %29 : vector<8x8xf32> to vector<1x8x8xf32>
    %34 = vector.shape_cast %30 : vector<8x8xf32> to vector<1x8x8xf32>
    %35 = vector.shape_cast %31 : vector<8x8xf32> to vector<1x8x8xf32>
    %36 = vector.shape_cast %32 : vector<8x8xf32> to vector<1x8x8xf32>
    %37 = tpu.concatenate %33, %34, %35, %36 in 0 : vector<1x8x8xf32>, vector<1x8x8xf32>, vector<1x8x8xf32>, vector<1x8x8xf32> -> vector<4x8x8xf32>
    %38 = vector.extract_strided_slice %28 {offsets = [0, 32], sizes = [8, 8], strides = [1, 1]} : vector<8x96xf32> to vector<8x8xf32>
    %39 = vector.extract_strided_slice %28 {offsets = [0, 40], sizes = [8, 8], strides = [1, 1]} : vector<8x96xf32> to vector<8x8xf32>
    %40 = vector.extract_strided_slice %28 {offsets = [0, 48], sizes = [8, 8], strides = [1, 1]} : vector<8x96xf32> to vector<8x8xf32>
    %41 = vector.extract_strided_slice %28 {offsets = [0, 56], sizes = [8, 8], strides = [1, 1]} : vector<8x96xf32> to vector<8x8xf32>
    %42 = vector.shape_cast %38 : vector<8x8xf32> to vector<1x8x8xf32>
    %43 = vector.shape_cast %39 : vector<8x8xf32> to vector<1x8x8xf32>
    %44 = vector.shape_cast %40 : vector<8x8xf32> to vector<1x8x8xf32>
    %45 = vector.shape_cast %41 : vector<8x8xf32> to vector<1x8x8xf32>
    %46 = tpu.concatenate %42, %43, %44, %45 in 0 : vector<1x8x8xf32>, vector<1x8x8xf32>, vector<1x8x8xf32>, vector<1x8x8xf32> -> vector<4x8x8xf32>
    %47 = vector.extract_strided_slice %28 {offsets = [0, 64], sizes = [8, 8], strides = [1, 1]} : vector<8x96xf32> to vector<8x8xf32>
    %48 = vector.extract_strided_slice %28 {offsets = [0, 72], sizes = [8, 8], strides = [1, 1]} : vector<8x96xf32> to vector<8x8xf32>
    %49 = vector.extract_strided_slice %28 {offsets = [0, 80], sizes = [8, 8], strides = [1, 1]} : vector<8x96xf32> to vector<8x8xf32>
    %50 = vector.extract_strided_slice %28 {offsets = [0, 88], sizes = [8, 8], strides = [1, 1]} : vector<8x96xf32> to vector<8x8xf32>
    %51 = vector.shape_cast %47 : vector<8x8xf32> to vector<1x8x8xf32>
    %52 = vector.shape_cast %48 : vector<8x8xf32> to vector<1x8x8xf32>
    %53 = vector.shape_cast %49 : vector<8x8xf32> to vector<1x8x8xf32>
    %54 = vector.shape_cast %50 : vector<8x8xf32> to vector<1x8x8xf32>
    %55 = tpu.concatenate %51, %52, %53, %54 in 0 : vector<1x8x8xf32>, vector<1x8x8xf32>, vector<1x8x8xf32>, vector<1x8x8xf32> -> vector<4x8x8xf32>
    %56 = arith.truncf %37 : vector<4x8x8xf32> to vector<4x8x8xbf16>
    %57 = arith.truncf %46 : vector<4x8x8xf32> to vector<4x8x8xbf16>
    %58 = arith.truncf %55 : vector<4x8x8xf32> to vector<4x8x8xbf16>
    "tpu.trace_start"() <{level = 10 : i32, message = "hnd,hmd->hnm"}> : () -> ()
    %cst_27 = arith.constant dense<0.000000e+00> : vector<4x8x8xf32>
    %59 = tpu.matmul %56, %57, %cst_27 {dimension_numbers = #tpu.dot_dimension_numbers<[2], [2], [1], [1], [0, 0, 0, 1, 1, 1], [0], [0]>} : vector<4x8x8xbf16>, vector<4x8x8xbf16>, vector<4x8x8xf32> -> vector<4x8x8xf32>
    "tpu.trace_stop"() : () -> ()
    %60 = vector.shape_cast %3 : vector<8x8xf32> to vector<1x8x8xf32>
    %61 = vector.broadcast %60 : vector<1x8x8xf32> to vector<4x8x8xf32>
    %62 = arith.addf %59, %61 : vector<4x8x8xf32>
    %cst_28 = arith.constant dense<0xFF800000> : vector<4x8xf32>
    %63 = vector.multi_reduction <maximumf>, %62, %cst_28 [2] : vector<4x8x8xf32> to vector<4x8xf32>
    %64 = vector.shape_cast %63 : vector<4x8xf32> to vector<4x8x1xf32>
    %65 = vector.broadcast %64 : vector<4x8x1xf32> to vector<4x8x8xf32>
    %66 = arith.subf %62, %65 : vector<4x8x8xf32>
    %67 = math.exp %66 : vector<4x8x8xf32>
    %cst_29 = arith.constant dense<0.000000e+00> : vector<4x8xf32>
    %68 = vector.multi_reduction <add>, %67, %cst_29 [2] : vector<4x8x8xf32> to vector<4x8xf32>
    %69 = vector.shape_cast %68 : vector<4x8xf32> to vector<4x8x1xf32>
    %70 = tpu.reciprocal %69 {approx = true} : vector<4x8x1xf32> -> vector<4x8x1xf32>
    %71 = vector.broadcast %70 : vector<4x8x1xf32> to vector<4x8x8xf32>
    %72 = arith.mulf %67, %71 : vector<4x8x8xf32>
    %73 = arith.truncf %72 : vector<4x8x8xf32> to vector<4x8x8xbf16>
    "tpu.trace_start"() <{level = 10 : i32, message = "hnm,hmd->hnd"}> : () -> ()
    %cst_30 = arith.constant dense<0.000000e+00> : vector<4x8x8xf32>
    %74 = tpu.matmul %73, %58, %cst_30 {dimension_numbers = #tpu.dot_dimension_numbers<[2], [1], [1], [2], [0, 0, 0, 1, 1, 2], [0], [0]>} : vector<4x8x8xbf16>, vector<4x8x8xbf16>, vector<4x8x8xf32> -> vector<4x8x8xf32>
    "tpu.trace_stop"() : () -> ()
    %75 = vector.shape_cast %6 : vector<32x32xbf16> to vector<4x8x32xbf16>
    %76 = arith.truncf %74 : vector<4x8x8xf32> to vector<4x8x8xbf16>
    "tpu.trace_start"() <{level = 10 : i32, message = "hnd,hde->hne"}> : () -> ()
    %cst_31 = arith.constant dense<0.000000e+00> : vector<4x8x32xf32>
    %77 = tpu.matmul %76, %75, %cst_31 {dimension_numbers = #tpu.dot_dimension_numbers<[2], [1], [1], [2], [0, 0, 0, 1, 1, 2], [0], [0]>} : vector<4x8x8xbf16>, vector<4x8x32xbf16>, vector<4x8x32xf32> -> vector<4x8x32xf32>
    "tpu.trace_stop"() : () -> ()
    %cst_32 = arith.constant dense<0.000000e+00> : vector<8x32xf32>
    %78 = vector.multi_reduction <add>, %77, %cst_32 [0] : vector<4x8x32xf32> to vector<8x32xf32>
    %79 = vector.broadcast %13 : vector<1x32xf32> to vector<8x32xf32>
    %80 = arith.addf %78, %79 : vector<8x32xf32>
    %81 = arith.addf %1, %80 : vector<8x32xf32>
    %cst_33 = arith.constant dense<0.000000e+00> : vector<8xf32>
    %82 = vector.multi_reduction <add>, %81, %cst_33 [1] : vector<8x32xf32> to vector<8xf32>
    %83 = vector.shape_cast %82 : vector<8xf32> to vector<8x1xf32>
    %cst_34 = arith.constant 3.200000e+01 : f32
    %84 = vector.broadcast %cst_34 : f32 to vector<8x1xf32>
    %85 = arith.divf %83, %84 : vector<8x1xf32>
    %86 = arith.mulf %81, %81 : vector<8x32xf32>
    %cst_35 = arith.constant dense<0.000000e+00> : vector<8xf32>
    %87 = vector.multi_reduction <add>, %86, %cst_35 [1] : vector<8x32xf32> to vector<8xf32>
    %88 = vector.shape_cast %87 : vector<8xf32> to vector<8x1xf32>
    %cst_36 = arith.constant 3.200000e+01 : f32
    %89 = vector.broadcast %cst_36 : f32 to vector<8x1xf32>
    %90 = arith.divf %88, %89 : vector<8x1xf32>
    %91 = arith.mulf %85, %85 : vector<8x1xf32>
    %92 = arith.subf %90, %91 : vector<8x1xf32>
    %93 = vector.broadcast %85 : vector<8x1xf32> to vector<8x32xf32>
    %94 = arith.subf %81, %93 : vector<8x32xf32>
    %cst_37 = arith.constant 9.99999974E-6 : f32
    %95 = vector.broadcast %cst_37 : f32 to vector<8x1xf32>
    %96 = arith.addf %92, %95 : vector<8x1xf32>
    %97 = math.rsqrt %96 : vector<8x1xf32>
    %98 = vector.broadcast %97 : vector<8x1xf32> to vector<8x32xf32>
    %99 = arith.mulf %94, %98 : vector<8x32xf32>
    %100 = vector.broadcast %19 : vector<1x32xf32> to vector<8x32xf32>
    %101 = arith.mulf %99, %100 : vector<8x32xf32>
    %102 = vector.broadcast %20 : vector<1x32xf32> to vector<8x32xf32>
    %103 = arith.addf %101, %102 : vector<8x32xf32>
    %104 = arith.truncf %103 : vector<8x32xf32> to vector<8x32xbf16>
    %cst_38 = arith.constant dense<0.000000e+00> : vector<8x32xf32>
    %105 = tpu.matmul %104, %7, %cst_38 {dimension_numbers = #tpu.dot_dimension_numbers<[1], [0], [0], [1], [0, 0, 1, 1], [], []>} : vector<8x32xbf16>, vector<32x32xbf16>, vector<8x32xf32> -> vector<8x32xf32>
    %106 = vector.broadcast %14 : vector<1x32xf32> to vector<8x32xf32>
    %107 = arith.addf %105, %106 : vector<8x32xf32>
    %108 = arith.truncf %2 : vector<8x32xf32> to vector<8x32xbf16>
    %cst_39 = arith.constant dense<0.000000e+00> : vector<8x64xf32>
    %109 = tpu.matmul %108, %8, %cst_39 {dimension_numbers = #tpu.dot_dimension_numbers<[1], [0], [0], [1], [0, 0, 1, 1], [], []>} : vector<8x32xbf16>, vector<32x64xbf16>, vector<8x64xf32> -> vector<8x64xf32>
    %110 = vector.broadcast %15 : vector<1x64xf32> to vector<8x64xf32>
    %111 = arith.addf %109, %110 : vector<8x64xf32>
    %112 = vector.extract_strided_slice %107 {offsets = [0, 0], sizes = [8, 8], strides = [1, 1]} : vector<8x32xf32> to vector<8x8xf32>
    %113 = vector.extract_strided_slice %107 {offsets = [0, 8], sizes = [8, 8], strides = [1, 1]} : vector<8x32xf32> to vector<8x8xf32>
    %114 = vector.extract_strided_slice %107 {offsets = [0, 16], sizes = [8, 8], strides = [1, 1]} : vector<8x32xf32> to vector<8x8xf32>
    %115 = vector.extract_strided_slice %107 {offsets = [0, 24], sizes = [8, 8], strides = [1, 1]} : vector<8x32xf32> to vector<8x8xf32>
    %116 = vector.shape_cast %112 : vector<8x8xf32> to vector<1x8x8xf32>
    %117 = vector.shape_cast %113 : vector<8x8xf32> to vector<1x8x8xf32>
    %118 = vector.shape_cast %114 : vector<8x8xf32> to vector<1x8x8xf32>
    %119 = vector.shape_cast %115 : vector<8x8xf32> to vector<1x8x8xf32>
    %120 = tpu.concatenate %116, %117, %118, %119 in 0 : vector<1x8x8xf32>, vector<1x8x8xf32>, vector<1x8x8xf32>, vector<1x8x8xf32> -> vector<4x8x8xf32>
    %121 = vector.extract_strided_slice %111 {offsets = [0, 0], sizes = [8, 8], strides = [1, 1]} : vector<8x64xf32> to vector<8x8xf32>
    %122 = vector.extract_strided_slice %111 {offsets = [0, 8], sizes = [8, 8], strides = [1, 1]} : vector<8x64xf32> to vector<8x8xf32>
    %123 = vector.extract_strided_slice %111 {offsets = [0, 16], sizes = [8, 8], strides = [1, 1]} : vector<8x64xf32> to vector<8x8xf32>
    %124 = vector.extract_strided_slice %111 {offsets = [0, 24], sizes = [8, 8], strides = [1, 1]} : vector<8x64xf32> to vector<8x8xf32>
    %125 = vector.shape_cast %121 : vector<8x8xf32> to vector<1x8x8xf32>
    %126 = vector.shape_cast %122 : vector<8x8xf32> to vector<1x8x8xf32>
    %127 = vector.shape_cast %123 : vector<8x8xf32> to vector<1x8x8xf32>
    %128 = vector.shape_cast %124 : vector<8x8xf32> to vector<1x8x8xf32>
    %129 = tpu.concatenate %125, %126, %127, %128 in 0 : vector<1x8x8xf32>, vector<1x8x8xf32>, vector<1x8x8xf32>, vector<1x8x8xf32> -> vector<4x8x8xf32>
    %130 = vector.extract_strided_slice %111 {offsets = [0, 32], sizes = [8, 8], strides = [1, 1]} : vector<8x64xf32> to vector<8x8xf32>
    %131 = vector.extract_strided_slice %111 {offsets = [0, 40], sizes = [8, 8], strides = [1, 1]} : vector<8x64xf32> to vector<8x8xf32>
    %132 = vector.extract_strided_slice %111 {offsets = [0, 48], sizes = [8, 8], strides = [1, 1]} : vector<8x64xf32> to vector<8x8xf32>
    %133 = vector.extract_strided_slice %111 {offsets = [0, 56], sizes = [8, 8], strides = [1, 1]} : vector<8x64xf32> to vector<8x8xf32>
    %134 = vector.shape_cast %130 : vector<8x8xf32> to vector<1x8x8xf32>
    %135 = vector.shape_cast %131 : vector<8x8xf32> to vector<1x8x8xf32>
    %136 = vector.shape_cast %132 : vector<8x8xf32> to vector<1x8x8xf32>
    %137 = vector.shape_cast %133 : vector<8x8xf32> to vector<1x8x8xf32>
    %138 = tpu.concatenate %134, %135, %136, %137 in 0 : vector<1x8x8xf32>, vector<1x8x8xf32>, vector<1x8x8xf32>, vector<1x8x8xf32> -> vector<4x8x8xf32>
    %139 = arith.truncf %120 : vector<4x8x8xf32> to vector<4x8x8xbf16>
    %140 = arith.truncf %129 : vector<4x8x8xf32> to vector<4x8x8xbf16>
    %141 = arith.truncf %138 : vector<4x8x8xf32> to vector<4x8x8xbf16>
    "tpu.trace_start"() <{level = 10 : i32, message = "hnd,hmd->hnm"}> : () -> ()
    %cst_40 = arith.constant dense<0.000000e+00> : vector<4x8x8xf32>
    %142 = tpu.matmul %139, %140, %cst_40 {dimension_numbers = #tpu.dot_dimension_numbers<[2], [2], [1], [1], [0, 0, 0, 1, 1, 1], [0], [0]>} : vector<4x8x8xbf16>, vector<4x8x8xbf16>, vector<4x8x8xf32> -> vector<4x8x8xf32>
    "tpu.trace_stop"() : () -> ()
    %143 = vector.shape_cast %4 : vector<8x8xf32> to vector<1x8x8xf32>
    %144 = vector.broadcast %143 : vector<1x8x8xf32> to vector<4x8x8xf32>
    %145 = arith.addf %142, %144 : vector<4x8x8xf32>
    %cst_41 = arith.constant dense<0xFF800000> : vector<4x8xf32>
    %146 = vector.multi_reduction <maximumf>, %145, %cst_41 [2] : vector<4x8x8xf32> to vector<4x8xf32>
    %147 = vector.shape_cast %146 : vector<4x8xf32> to vector<4x8x1xf32>
    %148 = vector.broadcast %147 : vector<4x8x1xf32> to vector<4x8x8xf32>
    %149 = arith.subf %145, %148 : vector<4x8x8xf32>
    %150 = math.exp %149 : vector<4x8x8xf32>
    %cst_42 = arith.constant dense<0.000000e+00> : vector<4x8xf32>
    %151 = vector.multi_reduction <add>, %150, %cst_42 [2] : vector<4x8x8xf32> to vector<4x8xf32>
    %152 = vector.shape_cast %151 : vector<4x8xf32> to vector<4x8x1xf32>
    %153 = tpu.reciprocal %152 {approx = true} : vector<4x8x1xf32> -> vector<4x8x1xf32>
    %154 = vector.broadcast %153 : vector<4x8x1xf32> to vector<4x8x8xf32>
    %155 = arith.mulf %150, %154 : vector<4x8x8xf32>
    %156 = arith.truncf %155 : vector<4x8x8xf32> to vector<4x8x8xbf16>
    "tpu.trace_start"() <{level = 10 : i32, message = "hnm,hmd->hnd"}> : () -> ()
    %cst_43 = arith.constant dense<0.000000e+00> : vector<4x8x8xf32>
    %157 = tpu.matmul %156, %141, %cst_43 {dimension_numbers = #tpu.dot_dimension_numbers<[2], [1], [1], [2], [0, 0, 0, 1, 1, 2], [0], [0]>} : vector<4x8x8xbf16>, vector<4x8x8xbf16>, vector<4x8x8xf32> -> vector<4x8x8xf32>
    "tpu.trace_stop"() : () -> ()
    %158 = vector.shape_cast %9 : vector<32x32xbf16> to vector<4x8x32xbf16>
    %159 = arith.truncf %157 : vector<4x8x8xf32> to vector<4x8x8xbf16>
    "tpu.trace_start"() <{level = 10 : i32, message = "hnd,hde->hne"}> : () -> ()
    %cst_44 = arith.constant dense<0.000000e+00> : vector<4x8x32xf32>
    %160 = tpu.matmul %159, %158, %cst_44 {dimension_numbers = #tpu.dot_dimension_numbers<[2], [1], [1], [2], [0, 0, 0, 1, 1, 2], [0], [0]>} : vector<4x8x8xbf16>, vector<4x8x32xbf16>, vector<4x8x32xf32> -> vector<4x8x32xf32>
    "tpu.trace_stop"() : () -> ()
    %cst_45 = arith.constant dense<0.000000e+00> : vector<8x32xf32>
    %161 = vector.multi_reduction <add>, %160, %cst_45 [0] : vector<4x8x32xf32> to vector<8x32xf32>
    %162 = vector.broadcast %16 : vector<1x32xf32> to vector<8x32xf32>
    %163 = arith.addf %161, %162 : vector<8x32xf32>
    %164 = arith.addf %103, %163 : vector<8x32xf32>
    %cst_46 = arith.constant dense<0.000000e+00> : vector<8xf32>
    %165 = vector.multi_reduction <add>, %164, %cst_46 [1] : vector<8x32xf32> to vector<8xf32>
    %166 = vector.shape_cast %165 : vector<8xf32> to vector<8x1xf32>
    %cst_47 = arith.constant 3.200000e+01 : f32
    %167 = vector.broadcast %cst_47 : f32 to vector<8x1xf32>
    %168 = arith.divf %166, %167 : vector<8x1xf32>
    %169 = arith.mulf %164, %164 : vector<8x32xf32>
    %cst_48 = arith.constant dense<0.000000e+00> : vector<8xf32>
    %170 = vector.multi_reduction <add>, %169, %cst_48 [1] : vector<8x32xf32> to vector<8xf32>
    %171 = vector.shape_cast %170 : vector<8xf32> to vector<8x1xf32>
    %cst_49 = arith.constant 3.200000e+01 : f32
    %172 = vector.broadcast %cst_49 : f32 to vector<8x1xf32>
    %173 = arith.divf %171, %172 : vector<8x1xf32>
    %174 = arith.mulf %168, %168 : vector<8x1xf32>
    %175 = arith.subf %173, %174 : vector<8x1xf32>
    %176 = vector.broadcast %168 : vector<8x1xf32> to vector<8x32xf32>
    %177 = arith.subf %164, %176 : vector<8x32xf32>
    %cst_50 = arith.constant 9.99999974E-6 : f32
    %178 = vector.broadcast %cst_50 : f32 to vector<8x1xf32>
    %179 = arith.addf %175, %178 : vector<8x1xf32>
    %180 = math.rsqrt %179 : vector<8x1xf32>
    %181 = vector.broadcast %180 : vector<8x1xf32> to vector<8x32xf32>
    %182 = arith.mulf %177, %181 : vector<8x32xf32>
    %183 = vector.broadcast %21 : vector<1x32xf32> to vector<8x32xf32>
    %184 = arith.mulf %182, %183 : vector<8x32xf32>
    %185 = vector.broadcast %22 : vector<1x32xf32> to vector<8x32xf32>
    %186 = arith.addf %184, %185 : vector<8x32xf32>
    %187 = arith.truncf %186 : vector<8x32xf32> to vector<8x32xbf16>
    %cst_51 = arith.constant dense<0.000000e+00> : vector<8x64xf32>
    %188 = tpu.matmul %187, %10, %cst_51 {dimension_numbers = #tpu.dot_dimension_numbers<[1], [0], [0], [1], [0, 0, 1, 1], [], []>} : vector<8x32xbf16>, vector<32x64xbf16>, vector<8x64xf32> -> vector<8x64xf32>
    %189 = vector.broadcast %17 : vector<1x64xf32> to vector<8x64xf32>
    %190 = arith.addf %188, %189 : vector<8x64xf32>
    %cst_52 = arith.constant 0.000000e+00 : f32
    %191 = vector.broadcast %cst_52 : f32 to vector<8x64xf32>
    %192 = arith.maximumf %190, %191 : vector<8x64xf32>
    %193 = arith.truncf %192 : vector<8x64xf32> to vector<8x64xbf16>
    %cst_53 = arith.constant dense<0.000000e+00> : vector<8x32xf32>
    %194 = tpu.matmul %193, %11, %cst_53 {dimension_numbers = #tpu.dot_dimension_numbers<[1], [0], [0], [1], [0, 0, 1, 1], [], []>} : vector<8x64xbf16>, vector<64x32xbf16>, vector<8x32xf32> -> vector<8x32xf32>
    %195 = vector.broadcast %18 : vector<1x32xf32> to vector<8x32xf32>
    %196 = arith.addf %194, %195 : vector<8x32xf32>
    %197 = arith.addf %186, %196 : vector<8x32xf32>
    %cst_54 = arith.constant dense<0.000000e+00> : vector<8xf32>
    %198 = vector.multi_reduction <add>, %197, %cst_54 [1] : vector<8x32xf32> to vector<8xf32>
    %199 = vector.shape_cast %198 : vector<8xf32> to vector<8x1xf32>
    %cst_55 = arith.constant 3.200000e+01 : f32
    %200 = vector.broadcast %cst_55 : f32 to vector<8x1xf32>
    %201 = arith.divf %199, %200 : vector<8x1xf32>
    %202 = arith.mulf %197, %197 : vector<8x32xf32>
    %cst_56 = arith.constant dense<0.000000e+00> : vector<8xf32>
    %203 = vector.multi_reduction <add>, %202, %cst_56 [1] : vector<8x32xf32> to vector<8xf32>
    %204 = vector.shape_cast %203 : vector<8xf32> to vector<8x1xf32>
    %cst_57 = arith.constant 3.200000e+01 : f32
    %205 = vector.broadcast %cst_57 : f32 to vector<8x1xf32>
    %206 = arith.divf %204, %205 : vector<8x1xf32>
    %207 = arith.mulf %201, %201 : vector<8x1xf32>
    %208 = arith.subf %206, %207 : vector<8x1xf32>
    %209 = vector.broadcast %201 : vector<8x1xf32> to vector<8x32xf32>
    %210 = arith.subf %197, %209 : vector<8x32xf32>
    %cst_58 = arith.constant 9.99999974E-6 : f32
    %211 = vector.broadcast %cst_58 : f32 to vector<8x1xf32>
    %212 = arith.addf %208, %211 : vector<8x1xf32>
    %213 = math.rsqrt %212 : vector<8x1xf32>
    %214 = vector.broadcast %213 : vector<8x1xf32> to vector<8x32xf32>
    %215 = arith.mulf %210, %214 : vector<8x32xf32>
    %216 = vector.broadcast %23 : vector<1x32xf32> to vector<8x32xf32>
    %217 = arith.mulf %215, %216 : vector<8x32xf32>
    %218 = vector.broadcast %24 : vector<1x32xf32> to vector<8x32xf32>
    %219 = arith.addf %217, %218 : vector<8x32xf32>
    %c0_59 = arith.constant 0 : index
    %c0_60 = arith.constant 0 : index
    %220 = vector.load %arg6[%c0_59, %c0_60] : memref<8x32xf32, #tpu.memory_space<vmem>>, vector<8x32xf32>
    tpu.vector_store %arg6[%c0_59, %c0_60], %219 {strides = array<i32>} : memref<8x32xf32, #tpu.memory_space<vmem>>, vector<8x32xf32>,
    return
  }
  func.func @transform_0(%arg0: i32) -> (i32, i32) {
    %c0_i32 = arith.constant 0 : i32
    %c0_i32_0 = arith.constant 0 : i32
    return %arg0, %c0_i32 : i32, i32
  }
  func.func @transform_1(%arg0: i32) -> (i32, i32) {
    %c0_i32 = arith.constant 0 : i32
    %c0_i32_0 = arith.constant 0 : i32
    return %arg0, %c0_i32 : i32, i32
  }
  func.func @transform_2(%arg0: i32) -> (i32, i32) {
    %c0_i32 = arith.constant 0 : i32
    %c0_i32_0 = arith.constant 0 : i32
    return %arg0, %c0_i32 : i32, i32
  }
  func.func @transform_3(%arg0: i32) -> (i32, i32) {
    %c0_i32 = arith.constant 0 : i32
    %c0_i32_0 = arith.constant 0 : i32
    %c0_i32_1 = arith.constant 0 : i32
    return %c0_i32, %c0_i32_0 : i32, i32
  }
  func.func @transform_4(%arg0: i32) -> (i32, i32) {
    %c0_i32 = arith.constant 0 : i32
    %c0_i32_0 = arith.constant 0 : i32
    %c0_i32_1 = arith.constant 0 : i32
    return %c0_i32, %c0_i32_0 : i32, i32
  }
  func.func @transform_5(%arg0: i32) -> (i32, i32) {
    %c0_i32 = arith.constant 0 : i32
    %c0_i32_0 = arith.constant 0 : i32
    return %arg0, %c0_i32 : i32, i32
  }
}

</mosaic_0001>

<bundles_post_ra>
// kernel: tpu_custom_call.1
= control target key start
LH: loop header
LB: loop body
LE: loop exit
PB: predicated region body
PF: predicated region fallthrough
CT: control target
= control target key end

     0   :  { %10 = vsyncpa [#allocation3], 0  ;;  %s3140_s0 = inlined_call_operand.vmem [shape: f32[32,32], index: 0, kind: input, shape index: {}]   ;;  %s3141_s1 = inlined_call_operand.vmem [shape: f32[16,8], index: 1, kind: input, shape index: {}]   ;;  %s3142_s2 = inlined_call_operand.vmem [shape: f32[16,8], index: 2, kind: input, shape index: {}]   ;;  %s3143_s3 = inlined_call_operand.hbm [shape: bf16[256,128], index: 3, kind: input, shape index: {}]   ;;  %s3144_s4 = inlined_call_operand.vmem [shape: f32[16,128], index: 4, kind: input, shape index: {}]   ;;  %s3145_s5 = inlined_call_operand.hbm [shape: f32[16,32], index: 5, kind: output, shape index: {}]  }
   0x1   :  { %11 = vsyncpa [#allocation4], 0 }
   0x2   :  { %13 = vsyncpa [#allocation4 + $0x1], 0  ;;  %s2704_s18 = smov 0   ;;  %s2706_s19 = smov 0  }
   0x3   :  { %s2708_s20 = smov 0   ;;  %s2710_s21 = smov 0  }
   0x4 LB: > { %s2725_s22 = sadd.s32 4294967295, %s2661_s21   ;;  %s2136_s23 = sadd.s32 4294967294, %s2661_s21   ;;  %s2661_s21 = sphi %s2710_s21, %s3161_s21   ;;  %s2657_s20 = sphi %s2708_s20, %s3160_s20   ;;  %s2653_s19 = sphi %s2706_s19, %s3159_s19   ;;  %s2649_s18 = sphi %s2704_s18, %s3158_s18  }
   0x5   : > { %s2729_s24 = sadd.s32 1, %s2661_s21   ;;  %s146_s25 = sadd.s32 1, %s2657_s20 }
   0x6   : > { %s143_s26 = ssub.s32 %s2661_s21, %s2729_s24  ;;  %p156_p0 = scmp.ne.s32.totalorder %s2657_s20, %s2653_s19 }
   0x7   : > { %p144_p1 = scmp.eq.s32.totalorder %s143_s26, 0  ;;  %p157_p2 = scmp.eq.s32.totalorder %s2725_s22, 1 }
   0x8   : > { %p162_p3 = scmp.ne.s32.totalorder %s2653_s19, %s2649_s18  ;;  %p163_p4 = scmp.eq.s32.totalorder %s2136_s23, 1 }
   0x9   : > { %s2740_s27 = scalar_select %p144_p1, %s2657_s20, %s146_s25  }
   0xa   : > { %p2742_p5 = por %p157_p2, %p156_p0  ;;  %p2746_p6 = por %p163_p4, %p162_p3 }
   0xb   : > { %p2137_p7 = scmp.ge.s32.totalorder %s2661_s21, 1  ;;  %p170_p8 = scmp.lt.s32.totalorder %s2661_s21, 3 }
   0xc   : > { %s3149_s28 = scalar_select %p2742_p5, 1, 0 }
   0xd   : > { %s3150_s29 = scalar_select %p2746_p6, 1, 0 }
   0xe   : > { %p3146_p9 = scmp.eq.s32.totalorder %s2725_s22, 0  ;;  %p2753_p10 = pnand %p2137_p7, %p170_p8 }
   0xf   : > { %s2663_s6 = smov [#allocation2]   ;;  %s2567_s11 = scalar_lea.hbm %s3143_s3, 2048 }
  0x10   : > { %s3151_s30 = scalar_select %p2753_p10, 1, 0 }
  0x11   : > { %s182_s7 = sshll.u32 %s2663_s6, 4  ;;  %p2464_p11 = pneg %p2753_p10  ;;  %s183_s7 = int_to_ptr.vmem [resolvable:$true] %s182_s7 }
  0x12   : > { %p2568_p13 = scmp.ne.s32.totalorder %s3143_s3, %s2567_s11  ;;  %p2574_p3 = scmp.lt.u32.totalorder %s2567_s11, %s3143_s3 }
  0x13   : > { %p2761_p12 = pnand %p3146_p9, %p2464_p11 }
  0x15   : > { %p2569_p0 = pneg %p2761_p12 }
  0x17   : > { %p2570_p1 = pnand %p2569_p0, %p2568_p13 }
  0x19   : > { %p2571_p2 = pneg %p2570_p1 }
  0x1b   : > { %p2576_p4 = pnand %p2574_p3, %p2571_p2 }
  0x1d   : > { %2579 = shalt.err (!%p2576_p4)
}
  0x1e   : > { %s2580_s16 = scalar_lea.vmem %s183_s7, 2048  ;;  %p2588_p9 = scmp.lt.s32.totalorder %s183_s7, %s183_s7 }
  0x1f   : > { %p2581_p7 = scmp.ne.s32.totalorder %s183_s7, %s2580_s16  ;;  %p2589_p6 = scmp.lt.s32.totalorder %s2580_s16, %s2580_s16 }
  0x21   : > { %p2583_p8 = pnand %p2581_p7, %p2569_p0  ;;  %p2590_p5 = por %p2589_p6, %p2588_p9 }
  0x23   : > { %p2584_p11 = pneg %p2583_p8 }
  0x25   : > { %p2591_p10 = pnand %p2590_p5, %p2584_p11 }
  0x27   : > { %2594 = shalt.err (!%p2591_p10)
}
  0x28   : > { %s2664_s17 = smov 64   ;;  %s2665_s23 = smov 4  }
  0x29   : > { %2467 = dma.hbm_to_vmem [thread:$0]  (!%p2761_p12), %s3143_s3, 2048, %s183_s7, [#allocation3], %s2664_s17, %s2664_s17, %s2665_s23  }
  0x2a   : > { %p3153_p13 = scmp.ne.s32.totalorder %s3151_s30, 0 }
  0x2b   : > { %p3154_p1 = scmp.eq.s32.totalorder (!%p3153_p13), %s2725_s22, 0 }
  0x2c   : > { %224 = sbr.rel (%p3153_p13) target bundleno = 3745 (0xea1), region = 40 }
  0x33   : > { %2640 = dma.done.wait (%p3154_p1), [#allocation3], 2048   ;;  %p3155_p0 = pmov %p3154_p1 }
  0x34   : > { %s2143_s6 = sshll.u32 %s2725_s22, 1  ;;  %v2666_v0 = vmov 0.0   ;;  %vm2667_vm0 = vmmov 0   ;;  %v2517_v1 = vld [vmem:[#allocation2] sm:$0xff]   ;;  %v2518_v2 = vld [vmem:[#allocation2 + $0x8] sm:$0xff]   ;;  %vm341_vm1 = vcmask 261120  }
  0x35   : > { %2642 = vsyncadd (%p3155_p0), [#allocation3], 4294965248  ;;  %2270 = vmatprep.subr.bf16.mxu1 %v2666_v0  ;;  %2274 = vmatprep.mubr.msk.bf16.mxu1 %vm2667_vm0, %v2666_v0  ;;  %p261_p5 = scmp.lt.s32.totalorder %s2143_s6, 3  ;;  %v2147_v5 = vld [vmem:[%s3144_s4] ss:$0 sm:$0xff]  ;;  %s2668_s12 = smov 104  }
  0x36   : > { %2284 = vmatprep.subr.bf16.mxu0 %v2666_v0  ;;  %2286 = vmatprep.mubr.msk.bf16.mxu0 %vm2667_vm0, %v2666_v0  ;;  %s2669_s13 = smov 120   ;;  %s2670_s14 = smov 112   ;;  %vm402_vm2 = vcmask 64512   ;;  %vm649_vm3 = vcmask 1043456   ;;  %vm1956_vm4 = vcmask 523264  }
  0x37   : > { %s3163_s6 = smov (!%p261_p5, %s2143_s6), 3  ;;  %2271 = vmatpush3.bf16.msra.mxu1 %v2517_v1  ;;  %s2671_s15 = smov 96  }
  0x38   : > { %s2144_s30 = sshll.u32 %s3163_s6, 3  ;;  %2272 = vmatprep.subr.bf16.mxu1 %v2666_v0  ;;  %p266_p6 = scmp.lt.s32.totalorder %s2725_s22, 1 }
  0x39   : > { %s2797_s9 = scalar_lea.vmem %s3140_s0, %s2144_s30  ;;  %s2672_s6 = smov 64  }
  0x3a   : > { %v2800_v3 = vld [vmem:[%s2797_s9] sm:$0xff]  ;;  %s2857_s16 = scalar_select %p266_p6, %s2725_s22, 1 }
  0x3b   : > { %v324_v4 = vpack.c.bf16 %v2800_v3, %v2800_v3  ;;  %2273 = vmatpush3.bf16.msra.mxu1 %v2518_v2  ;;  %s257_s25 = sand.u32 1, %s2653_s19   ;;  %p3156_p10 = scmp.ne.s32.totalorder %s3149_s28, 0 }
  0x3c   : > { %2278 = vmatprep.subr.bf16.mxu1 %v2666_v0  ;;  %s2145_s17 = sshll.u32 %s2857_s16, 3 }
  0x3d   : > { %s269_s26 = scalar_lea.vmem %s3141_s1, %s2145_s17 }
  0x3e   : > { %2275 = vmatmul.mubr.msk.bf16.vlgmr.msra.gmra.mrb[0].mxu1 %vm341_vm1, %v324_v4  ;;  %v277_v26 = vld [vmem:[%s269_s26] sm:$0xff]  ;;  %s2142_s26 = sshll.u32 %s257_s25, 3 }
  0x3f   : > { %2280 = vmatprep.mubr.msk.bf16.mxu1 %vm2667_vm0, %v2666_v0  ;;  %s259_s16 = scalar_lea.vmem [#allocation5], %s2142_s26 }
 0x111   : > { %v379_v6 = vpop.f32.mrb[0].mxu1 }
 0x112   : > { %v380_v7 = vadd.f32 %v2147_v5, %v379_v6  ;;  %v2276_v8 = vpop.f32.mrb[1].mxu1 }
 0x113   : > { %v382_v9 = vpop.f32.mrb[2].mxu1 }
 0x114   : > { %392 = vrot.lane.b32.xlu1 %v380_v7, %s2668_s12  ;;  %386 = vrot.lane.b32.xlu0 %v380_v7, %s2669_s13  ;;  %v2277_v10 = vpop.f32.mrb[3].mxu1  ;;  %v2814_v11 = vpack.c.bf16 %v380_v7, %v380_v7 }
 0x118   : > { %389 = vrot.lane.b32.xlu0 %v380_v7, %s2670_s14  ;;  %400 = vrot.lane.b32.xlu1 %v2814_v11, %s2671_s15 }
 0x186   : > { %v393_v12 = vpop.permute.xlu1 %392  ;;  %v387_v13 = vpop.permute.xlu0 %386 }
 0x187   : > { %v2819_v14 = vpack.c.bf16 %v387_v13, %v387_v13  ;;  %v2823_v17 = vpack.c.bf16 %v393_v12, %v393_v12 }
 0x189   : > { %450 = vrot.lane.b32.xlu0 %v2819_v14, %s2671_s15 }
 0x18a   : > { %v390_v15 = vpop.permute.xlu0 %389  ;;  %v401_v16 = vpop.permute.xlu1 %400 }
 0x18b   : > { %v2825_v18 = vpack.c.bf16 %v390_v15, %v390_v15  ;;  %v407_v19 = vsel %vm402_vm2, %v401_v16, 0 }
 0x18c   : > { %2279 = vmatpush3.bf16.xpose.msra.mxu1 %v407_v19 }
 0x18d   : > { %548 = vrot.lane.b32.xlu0 %v2823_v17, %s2671_s15  ;;  %499 = vrot.lane.b32.xlu1 %v2825_v18, %s2671_s15 }
 0x18e   : > { %2290 = vmatprep.subr.bf16.mxu1 %v2666_v0 }
 0x193   : > { %2281 = vmatmul.mubr.msk.bf16.vlgmr.msra.gmra.mrb[4].mxu1 %vm402_vm2, %v2814_v11 }
 0x194   : > { %2292 = vmatprep.mubr.msk.bf16.mxu1 %vm2667_vm0, %v2666_v0 }
 0x1fb   : > { %v451_v20 = vpop.permute.xlu0 %450 }
 0x1fc   : > { %v456_v21 = vsel %vm402_vm2, %v451_v20, 0 }
 0x1fd   : > { %2285 = vmatpush3.bf16.xpose.msra.mxu0 %v456_v21 }
 0x1fe   : > { %2296 = vmatprep.subr.bf16.mxu0 %v2666_v0 }
 0x1ff   : > { %v500_v22 = vpop.permute.xlu1 %499  ;;  %v549_v24 = vpop.permute.xlu0 %548 }
 0x200   : > { %v505_v23 = vsel %vm402_vm2, %v500_v22, 0  ;;  %v554_v25 = vsel %vm402_vm2, %v549_v24, 0 }
 0x201   : > { %2291 = vmatpush3.bf16.xpose.msra.mxu1 %v505_v23 }
 0x202   : > { %2302 = vmatprep.subr.bf16.mxu1 %v2666_v0 }
 0x204   : > { %2287 = vmatmul.mubr.msk.bf16.vlgmr.msra.gmra.mrb[0].mxu0 %vm402_vm2, %v2819_v14 }
 0x205   : > { %2297 = vmatpush3.bf16.xpose.msra.mxu0 %v554_v25  ;;  %2298 = vmatprep.mubr.msk.bf16.mxu0 %vm2667_vm0, %v2666_v0 }
 0x206   : > { %2308 = vmatprep.subr.bf16.mxu0 %v2666_v0 }
 0x208   : > { %2293 = vmatmul.mubr.msk.bf16.vlgmr.msra.gmra.mrb[8].mxu1 %vm402_vm2, %v2825_v18 }
 0x209   : > { %2304 = vmatprep.mubr.msk.bf16.mxu1 %vm2667_vm0, %v2666_v0 }
 0x20c   : > { %2299 = vmatmul.mubr.msk.bf16.vlgmr.msra.gmra.mrb[4].mxu0 %vm402_vm2, %v2823_v17 }
 0x20d   : > { %2310 = vmatprep.mubr.msk.bf16.mxu0 %vm2667_vm0, %v2666_v0 }
 0x266   : > { %v443_v27 = vpop.f32.mrb[4].mxu1 }
 0x267   : > { %v444_v28 = vadd.f32 %v443_v27, %v277_v26  ;;  %v2282_v29 = vpop.f32.mrb[5].mxu1  ;;  %v283_v27 = vld [vmem:[#allocation2 + $0x10] sm:$0xf] }
 0x268   : > { %v446_v30 = vpop.f32.mrb[6].mxu1 }
 0x269   : > { %v2283_v31 = vpop.f32.mrb[7].mxu1  ;;  %v596_v32 = vsel %vm402_vm2, %v444_v28, -inf }
 0x26a   : > { %597 = vmax.xlane.f32.xlu1 %v596_v32  ;;  %v845_v31 = vsel %vm649_vm3, %v283_v27, 0 }
 0x2d7   : > { %v492_v33 = vpop.f32.mrb[0].mxu0 }
 0x2d8   : > { %v493_v34 = vadd.f32 %v492_v33, %v277_v26  ;;  %v2288_v35 = vpop.f32.mrb[1].mxu0  ;;  %v284_v33 = vld [vmem:[#allocation2 + $0x14] sm:$0xf] }
 0x2d9   : > { %v495_v36 = vpop.f32.mrb[2].mxu0 }
 0x2da   : > { %v2289_v37 = vpop.f32.mrb[3].mxu0  ;;  %v599_v38 = vsel %vm402_vm2, %v493_v34, -inf  ;;  %v891_v36 = vsel %vm649_vm3, %v284_v33, 0 }
 0x2db   : > { %600 = vmax.xlane.f32.xlu0 %v599_v38  ;;  %v541_v39 = vpop.f32.mrb[8].mxu1  ;;  %v285_v37 = vld [vmem:[#allocation2 + $0x18] sm:$0xf] }
 0x2dc   : > { %v542_v40 = vadd.f32 %v541_v39, %v277_v26  ;;  %v2294_v41 = vpop.f32.mrb[9].mxu1 }
 0x2dd   : > { %v544_v42 = vpop.f32.mrb[10].mxu1  ;;  %v937_v41 = vsel %vm649_vm3, %v285_v37, 0 }
 0x2de   : > { %v2295_v43 = vpop.f32.mrb[11].mxu1  ;;  %v602_v44 = vsel %vm402_vm2, %v542_v40, -inf }
 0x2df   : > { %v590_v45 = vpop.f32.mrb[4].mxu0  ;;  %603 = vmax.xlane.f32.xlu0 %v602_v44  ;;  %v286_v44 = vld [vmem:[#allocation2 + $0x1c] sm:$0xf] }
 0x2e0   : > { %v591_v46 = vadd.f32 %v590_v45, %v277_v26  ;;  %v2300_v47 = vpop.f32.mrb[5].mxu0 }
 0x2e1   : > { %v593_v48 = vpop.f32.mrb[6].mxu0 }
 0x2e2   : > { %v2301_v49 = vpop.f32.mrb[7].mxu0  ;;  %v605_v50 = vsel %vm402_vm2, %v591_v46, -inf  ;;  %v983_v48 = vsel %vm649_vm3, %v286_v44, 0  ;;  %v2165_v44 = vld [vmem:[%s3144_s4 + $0x8] ss:$0 sm:$0xff] }
 0x2e3   : > { %606 = vmax.xlane.f32.xlu1 %v605_v50 }
 0x2f4   : > { %693 = vrot.lane.b32.xlu1 %v2819_v14, %s2672_s6 }
 0x2f5   : > { %644 = vrot.lane.b32.xlu0 %v2814_v11, %s2672_s6 }
 0x2f7   : > { %v598_v51 = vpop.xlane.xlu1 %597 }
 0x2f8   : > { %v608_v52 = vsub.f32 %v444_v28, %v598_v51 }
 0x2fa   : > { %v612_v53 = vmul.f32 1.442695, %v608_v52 }
 0x2fc   : > { %2529 = vpow2.f32 %v612_v53 }
 0x306   : > { %v2530_v54 = vpop.eup %2529 }
 0x307   : > { %v620_v55 = vsel %vm402_vm2, %v2530_v54, 0.0 }
 0x314   : > { %621 = vadd.xlane.f32.xlu0 %v620_v55 }
 0x368   : > { %v601_v56 = vpop.xlane.xlu0 %600 }
 0x369   : > { %v609_v57 = vsub.f32 %v493_v34, %v601_v56 }
 0x36b   : > { %v614_v58 = vmul.f32 1.442695, %v609_v57 }
 0x36c   : > { %v604_v59 = vpop.xlane.xlu0 %603 }
 0x36d   : > { %2531 = vpow2.f32 %v614_v58  ;;  %v610_v60 = vsub.f32 %v542_v40, %v604_v59 }
 0x36f   : > { %v616_v61 = vmul.f32 1.442695, %v610_v60 }
 0x370   : > { %v607_v62 = vpop.xlane.xlu1 %606  ;;  %v645_v63 = vpop.permute.xlu0 %644 }
 0x371   : > { %2533 = vpow2.f32 %v616_v61  ;;  %v611_v1 = vsub.f32 %v591_v46, %v607_v62  ;;  %v651_v2 = vsel %vm649_vm3, %v645_v63, 0 }
 0x372   : > { %2303 = vmatpush3.bf16.msra.mxu1 %v651_v2 }
 0x373   : > { %v618_v4 = vmul.f32 1.442695, %v611_v1  ;;  %2314 = vmatprep.subr.bf16.mxu1 %v2666_v0 }
 0x374   : > { %v694_v5 = vpop.permute.xlu1 %693 }
 0x375   : > { %2535 = vpow2.f32 %v618_v4  ;;  %v699_v6 = vsel %vm649_vm3, %v694_v5, 0 }
 0x376   : > { %2309 = vmatpush3.bf16.msra.mxu0 %v699_v6 }
 0x377   : > { %v2532_v7 = vpop.eup %2531  ;;  %2320 = vmatprep.subr.bf16.mxu0 %v2666_v0 }
 0x378   : > { %v623_v8 = vsel %vm402_vm2, %v2532_v7, 0.0 }
 0x379   : > { %624 = vadd.xlane.f32.xlu1 %v623_v8 }
 0x37b   : > { %v2534_v9 = vpop.eup %2533 }
 0x37c   : > { %v626_v10 = vsel %vm402_vm2, %v2534_v9, 0.0 }
 0x37d   : > { %627 = vadd.xlane.f32.xlu0 %v626_v10 }
 0x37f   : > { %v2536_v11 = vpop.eup %2535 }
 0x380   : > { %v629_v12 = vsel %vm402_vm2, %v2536_v11, 0.0 }
 0x381   : > { %630 = vadd.xlane.f32.xlu1 %v629_v12 }
 0x392   : > { %741 = vrot.lane.b32.xlu1 %v2825_v18, %s2672_s6 }
 0x393   : > { %789 = vrot.lane.b32.xlu0 %v2823_v17, %s2672_s6 }
 0x3a1   : > { %v622_v13 = vpop.xlane.xlu0 %621 }
 0x3a2   : > { %2537 = vrcp.f32 %v622_v13 }
 0x3ac   : > { %v2538_v14 = vpop.eup %2537 }
 0x3ad   : > { %v636_v15 = vmul.f32 %v2538_v14, %v2530_v54 }
 0x3af   : > { %v640_v16 = vpack.c.bf16 %v636_v15, %v636_v15 }
 0x3b1   : > { %2305 = vmatmul.mubr.msk.bf16.vlgmr.msra.gmra.mrb[12].mxu1 %vm402_vm2, %v640_v16 }
 0x3b2   : > { %2316 = vmatprep.mubr.msk.bf16.mxu1 %vm2667_vm0, %v2666_v0 }
 0x406   : > { %v625_v19 = vpop.xlane.xlu1 %624 }
 0x407   : > { %2539 = vrcp.f32 %v625_v19  ;;  %v2163_v19 = vld [vmem:[%s3144_s4 + $0x1] ss:$0 sm:$0xff] }
 0x40a   : > { %v628_v20 = vpop.xlane.xlu0 %627 }
 0x40b   : > { %2541 = vrcp.f32 %v628_v20 }
 0x40e   : > { %v631_v21 = vpop.xlane.xlu1 %630  ;;  %v790_v17 = vpop.permute.xlu0 %789 }
 0x40f   : > { %2543 = vrcp.f32 %v631_v21  ;;  %v795_v29 = vsel %vm649_vm3, %v790_v17, 0 }
 0x411   : > { %v2540_v18 = vpop.eup %2539 }
 0x412   : > { %v637_v22 = vmul.f32 %v2540_v18, %v2532_v7  ;;  %v742_v23 = vpop.permute.xlu1 %741 }
 0x413   : > { %v747_v24 = vsel %vm649_vm3, %v742_v23, 0 }
 0x414   : > { %2315 = vmatpush3.bf16.msra.mxu1 %v747_v24  ;;  %v641_v25 = vpack.c.bf16 %v637_v22, %v637_v22 }
 0x415   : > { %v2542_v26 = vpop.eup %2541  ;;  %2326 = vmatprep.subr.bf16.mxu1 %v2666_v0 }
 0x416   : > { %v638_v28 = vmul.f32 %v2542_v26, %v2534_v9  ;;  %2311 = vmatmul.mubr.msk.bf16.vlgmr.msra.gmra.mrb[8].mxu0 %vm402_vm2, %v641_v25 }
 0x417   : > { %2321 = vmatpush3.bf16.msra.mxu0 %v795_v29  ;;  %2322 = vmatprep.mubr.msk.bf16.mxu0 %vm2667_vm0, %v2666_v0  ;;  %v276_v29 = vld [vmem:[%s2797_s9 + $0x8] sm:$0xff]  ;;  %s2028_s9 = scalar_lea.sflag [#allocation4], %s257_s25 }
 0x418   : > { %v642_v30 = vpack.c.bf16 %v638_v28, %v638_v28  ;;  %2332 = vmatprep.subr.bf16.mxu0 %v2666_v0  ;;  %v2519_v28 = vld [vmem:[#allocation2 + $0x30] sm:$0xff]  }
 0x419   : > { %v2544_v32 = vpop.eup %2543 }
 0x41a   : > { %v639_v34 = vmul.f32 %v2544_v32, %v2536_v11  ;;  %2317 = vmatmul.mubr.msk.bf16.vlgmr.msra.gmra.mrb[16].mxu1 %vm402_vm2, %v642_v30  ;;  %v2520_v30 = vld [vmem:[#allocation2 + $0x38] sm:$0xff]   ;;  %v2522_v32 = vld [vmem:[#allocation2 + $0x28] sm:$0xff]  }
 0x41b   : > { %2327 = vmatpush3.bf16.msra.mxu1 %v845_v31  ;;  %2328 = vmatprep.mubr.msk.bf16.mxu1 %vm2667_vm0, %v2666_v0  ;;  %v1124_v31 = vpack.c.bf16 %v276_v29, %v276_v29 }
 0x41c   : > { %v643_v35 = vpack.c.bf16 %v639_v34, %v639_v34  ;;  %2338 = vmatprep.subr.bf16.mxu1 %v2666_v0 }
 0x41e   : > { %2323 = vmatmul.mubr.msk.bf16.vlgmr.msra.gmra.mrb[12].mxu0 %vm402_vm2, %v643_v35 }
 0x41f   : > { %2333 = vmatpush3.bf16.msra.mxu0 %v891_v36  ;;  %2334 = vmatprep.mubr.msk.bf16.mxu0 %vm2667_vm0, %v2666_v0 }
 0x420   : > { %2344 = vmatprep.subr.bf16.mxu0 %v2666_v0 }
 0x484   : > { %v687_v38 = vpop.f32.mrb[12].mxu1 }
 0x485   : > { %v837_v39 = vpack.c.bf16 %v687_v38, %v687_v38  ;;  %v2306_v40 = vpop.f32.mrb[13].mxu1 }
 0x486   : > { %v690_v42 = vpop.f32.mrb[14].mxu1 }
 0x487   : > { %v2307_v43 = vpop.f32.mrb[15].mxu1  ;;  %2329 = vmatmul.mubr.msk.bf16.vlgmr.msra.gmra.mrb[20].mxu1 %vm402_vm2, %v837_v39  ;;  %v2164_v42 = vld [vmem:[%s3144_s4 + $0x7] ss:$0 sm:$0xff] }
 0x488   : > { %2339 = vmatpush3.bf16.msra.mxu1 %v937_v41  ;;  %2340 = vmatprep.mubr.msk.bf16.mxu1 %vm2667_vm0, %v2666_v0 }
 0x489   : > { %2350 = vmatprep.subr.bf16.mxu1 %v2666_v0 }
 0x4e9   : > { %v735_v45 = vpop.f32.mrb[8].mxu0 }
 0x4ea   : > { %v838_v46 = vpack.c.bf16 %v735_v45, %v735_v45  ;;  %v2312_v47 = vpop.f32.mrb[9].mxu0 }
 0x4eb   : > { %v738_v49 = vpop.f32.mrb[10].mxu0 }
 0x4ec   : > { %v2313_v50 = vpop.f32.mrb[11].mxu0  ;;  %2335 = vmatmul.mubr.msk.bf16.vlgmr.msra.gmra.mrb[16].mxu0 %vm402_vm2, %v838_v46 }
 0x4ed   : > { %v783_v51 = vpop.f32.mrb[16].mxu1  ;;  %2345 = vmatpush3.bf16.msra.mxu0 %v983_v48  ;;  %2346 = vmatprep.mubr.msk.bf16.mxu0 %vm2667_vm0, %v2666_v0  ;;  %v2170_v48 = vld [vmem:[%s3144_s4 + $0x3] ss:$0 sm:$0xff] }
 0x4ee   : > { %v839_v52 = vpack.c.bf16 %v783_v51, %v783_v51  ;;  %v2318_v53 = vpop.f32.mrb[17].mxu1  ;;  %2358 = vmatprep.subr.bf16.mxu0 %v2666_v0 }
 0x4ef   : > { %v786_v54 = vpop.f32.mrb[18].mxu1 }
 0x4f0   : > { %v2319_v55 = vpop.f32.mrb[19].mxu1  ;;  %2341 = vmatmul.mubr.msk.bf16.vlgmr.msra.gmra.mrb[24].mxu1 %vm402_vm2, %v839_v52 }
 0x4f1   : > { %v831_v56 = vpop.f32.mrb[12].mxu0  ;;  %2354 = vmatprep.mubr.msk.bf16.mxu1 %vm2667_vm0, %v2666_v0 }
 0x4f2   : > { %v840_v57 = vpack.c.bf16 %v831_v56, %v831_v56  ;;  %v2324_v58 = vpop.f32.mrb[13].mxu0 }
 0x4f3   : > { %v834_v59 = vpop.f32.mrb[14].mxu0 }
 0x4f4   : > { %v2325_v60 = vpop.f32.mrb[15].mxu0  ;;  %2347 = vmatmul.mubr.msk.bf16.vlgmr.msra.gmra.mrb[20].mxu0 %vm402_vm2, %v840_v57 }
 0x4f5   : > { %2362 = vmatprep.mubr.msk.bf16.mxu0 %vm2667_vm0, %v2666_v0  ;;  %2359 = vmatpush3.bf16.msra.mxu0 %v2519_v28  ;;  %v2166_v60 = vld [vmem:[%s3144_s4 + $0x2] ss:$0 sm:$0xff] }
 0x4f6   : > { %2360 = vmatprep.subr.bf16.mxu0 %v2666_v0 }
 0x4f9   : > { %2361 = vmatpush3.bf16.msra.mxu0 %v2520_v30 }
 0x4fa   : > { %2372 = vmatprep.subr.bf16.mxu0 %v2666_v0 }
 0x4fc   : > { %2363 = vmatmul.mubr.msk.bf16.vlgmr.msra.gmra.mrb[24].mxu0 %vm341_vm1, %v1124_v31 }
 0x4fd   : > { %2374 = vmatprep.mubr.msk.bf16.mxu0 %vm2667_vm0, %v2666_v0 }
 0x55a   : > { %v881_v61 = vpop.f32.mrb[20].mxu1 }
 0x55b   : > { %v2330_v62 = vpop.f32.mrb[21].mxu1  ;;  %v1025_v4 = vsel %vm341_vm1, %v881_v61, 0.0 }
 0x55c   : > { %v884_v63 = vpop.f32.mrb[22].mxu1 }
 0x55d   : > { %v2331_v1 = vpop.f32.mrb[23].mxu1 }
 0x5bf   : > { %v927_v2 = vpop.f32.mrb[16].mxu0 }
 0x5c0   : > { %v1026_v5 = vsel %vm341_vm1, %v927_v2, 0.0  ;;  %v2336_v6 = vpop.f32.mrb[17].mxu0 }
 0x5c1   : > { %v1027_v7 = vadd.f32 %v1026_v5, %v1025_v4  ;;  %v930_v8 = vpop.f32.mrb[18].mxu0 }
 0x5c2   : > { %v2337_v9 = vpop.f32.mrb[19].mxu0 }
 0x5c3   : > { %v973_v10 = vpop.f32.mrb[24].mxu1 }
 0x5c4   : > { %v1028_v11 = vsel %vm341_vm1, %v973_v10, 0.0  ;;  %v2342_v12 = vpop.f32.mrb[25].mxu1 }
 0x5c5   : > { %v1029_v13 = vadd.f32 %v1028_v11, %v1027_v7  ;;  %v976_v14 = vpop.f32.mrb[26].mxu1 }
 0x5c6   : > { %v2343_v15 = vpop.f32.mrb[27].mxu1 }
 0x5c7   : > { %v1019_v16 = vpop.f32.mrb[20].mxu0 }
 0x5c8   : > { %v1030_v20 = vsel %vm341_vm1, %v1019_v16, 0.0  ;;  %v2348_v21 = vpop.f32.mrb[21].mxu0 }
 0x5c9   : > { %v1031_v18 = vadd.f32 %v1030_v20, %v1029_v13  ;;  %v1022_v22 = vpop.f32.mrb[22].mxu0 }
 0x5ca   : > { %v2349_v23 = vpop.f32.mrb[23].mxu0 }
 0x5cb   : > { %v1036_v17 = vadd.f32 %v2163_v19, %v1031_v18 }
 0x5cd   : > { %v1037_v24 = vadd.f32 %v1036_v17, %v2800_v3  ;;  %v2521_v3 = vld [vmem:[#allocation2 + $0x20] sm:$0xff]  }
 0x5ce   : > { %2351 = vmatpush3.bf16.msra.mxu1 %v2521_v3 }
 0x5cf   : > { %v1038_v25 = vsel %vm341_vm1, %v1037_v24, 0.0  ;;  %v1043_v26 = vmul.f32 %v1037_v24, %v1037_v24  ;;  %2352 = vmatprep.subr.bf16.mxu1 %v2666_v0  ;;  %v1178_v49 = vpop.f32.mrb[24].mxu0 }
 0x5d0   : > { %1039 = vadd.xlane.f32.xlu1 %v1038_v25  ;;  %v1179_v50 = vadd.f32 %v2170_v48, %v1178_v49  ;;  %v2364_v51 = vpop.f32.mrb[25].mxu0 }
 0x5d1   : > { %v1044_v27 = vsel %vm341_vm1, %v1043_v26, 0.0  ;;  %v1181_v52 = vpop.f32.mrb[26].mxu0 }
 0x5d2   : > { %1045 = vadd.xlane.f32.xlu0 %v1044_v27  ;;  %2353 = vmatpush3.bf16.msra.mxu1 %v2522_v32  ;;  %v2365_v53 = vpop.f32.mrb[27].mxu0  ;;  %v2957_v54 = vpack.c.bf16 %v1179_v50, %v1179_v50 }
 0x5d3   : > { %2366 = vmatprep.subr.bf16.mxu1 %v2666_v0 }
 0x5d4   : > { %v1216_v55 = vsel %vm402_vm2, %v2957_v54, 0 }
 0x5e1   : > { %1198 = vrot.lane.b32.xlu1 %v1179_v50, %s2670_s14 }
 0x5e8   : > { %1195 = vrot.lane.b32.xlu0 %v1179_v50, %s2669_s13 }
 0x5ec   : > { %1201 = vrot.lane.b32.xlu0 %v1179_v50, %s2668_s12 }
 0x65d   : > { %v1040_v33 = vpop.xlane.xlu1 %1039 }
 0x65e   : > { %v1042_v34 = vmul.f32 0.03125, %v1040_v33 }
 0x65f   : > { %v1046_v35 = vpop.xlane.xlu0 %1045 }
 0x660   : > { %v1048_v36 = vmul.f32 %v1042_v34, %v1042_v34  ;;  %v1047_v37 = vmul.f32 0.03125, %v1046_v35  ;;  %v1050_v40 = vsub.f32 %v1037_v24, %v1042_v34 }
 0x661   : > { %v1199_v59 = vpop.permute.xlu1 %1198 }
 0x662   : > { %v1049_v38 = vsub.f32 %v1047_v37, %v1048_v36  ;;  %v2971_v61 = vpack.c.bf16 %v1199_v59, %v1199_v59 }
 0x663   : > { %v1196_v56 = vpop.permute.xlu0 %1195 }
 0x664   : > { %v1051_v39 = vadd.f32 1e-05, %v1049_v38  ;;  %v2963_v57 = vpack.c.bf16 %v1196_v56, %v1196_v56  ;;  %v1308_v6 = vsel %vm402_vm2, %v2971_v61, 0 }
 0x666   : > { %2545 = vrsqrt.f32 %v1051_v39  ;;  %v1262_v58 = vsel %vm402_vm2, %v2963_v57, 0 }
 0x667   : > { %2373 = vmatpush3.bf16.xpose.msra.mxu0 %v1262_v58  ;;  %v1202_v7 = vpop.permute.xlu0 %1201 }
 0x668   : > { %2384 = vmatprep.subr.bf16.mxu0 %v2666_v0  ;;  %v2982_v8 = vpack.c.bf16 %v1202_v7, %v1202_v7 }
 0x66a   : > { %v1354_v11 = vsel %vm402_vm2, %v2982_v8, 0 }
 0x670   : > { %v2546_v41 = vpop.eup %2545 }
 0x671   : > { %v1053_v43 = vmul.f32 %v2546_v41, %v1050_v40 }
 0x673   : > { %v1058_v45 = vmul.f32 %v2164_v42, %v1053_v43 }
 0x675   : > { %v2945_v46 = vadd.f32 %v2165_v44, %v1058_v45 }
 0x677   : > { %v1064_v47 = vpack.c.bf16 %v2945_v46, %v2945_v46 }
 0x679   : > { %2355 = vmatmul.mubr.msk.bf16.vlgmr.msra.gmra.mrb[28].mxu1 %vm341_vm1, %v1064_v47 }
 0x67a   : > { %2368 = vmatprep.mubr.msk.bf16.mxu1 %vm2667_vm0, %v2666_v0  ;;  %2367 = vmatpush3.bf16.xpose.msra.mxu1 %v1216_v55 }
 0x67b   : > { %2378 = vmatprep.subr.bf16.mxu1 %v2666_v0 }
 0x74c   : > { %v1118_v62 = vpop.f32.mrb[28].mxu1 }
 0x74d   : > { %v1119_v63 = vadd.f32 %v2166_v60, %v1118_v62  ;;  %v2356_v1 = vpop.f32.mrb[29].mxu1 }
 0x74e   : > { %v1121_v2 = vpop.f32.mrb[30].mxu1 }
 0x74f   : > { %v1204_v4 = vpack.c.bf16 %v1119_v63, %v1119_v63  ;;  %1191 = vrot.lane.b32.xlu0 %v1119_v63, %s2668_s12  ;;  %1185 = vrot.lane.b32.xlu1 %v1119_v63, %s2669_s13  ;;  %v2357_v5 = vpop.f32.mrb[31].mxu1 }
 0x751   : > { %2369 = vmatmul.mubr.msk.bf16.vlgmr.msra.gmra.mrb[32].mxu1 %vm402_vm2, %v1204_v4 }
 0x752   : > { %2379 = vmatpush3.bf16.xpose.msra.mxu1 %v1308_v6  ;;  %2380 = vmatprep.mubr.msk.bf16.mxu1 %vm2667_vm0, %v2666_v0 }
 0x753   : > { %1188 = vrot.lane.b32.xlu1 %v1119_v63, %s2670_s14  ;;  %2390 = vmatprep.subr.bf16.mxu1 %v2666_v0  ;;  %s273_s14 = scalar_lea.vmem %s3142_s2, %s2145_s17  ;;  %s2041_s17 = sshll.u32 %s259_s16, 4  ;;  %s3099_s17 = int_to_ptr.vmem [resolvable:$true] %s2041_s17 }
 0x754   : > { %v278_v16 = vld [vmem:[%s273_s14] sm:$0xff]  ;;  %s2595_s10 = scalar_lea.vmem %s3099_s17, 128 }
 0x755   : > { %p2596_p9 = scmp.ne.s32.totalorder %s3099_s17, %s2595_s10 }
 0x757   : > { %p2597_p12 = pnand %p2596_p9, %p3156_p10 }
 0x759   : > { %p2598_p2 = pneg %p2597_p12 }
 0x7c1   : > { %v1186_v9 = vpop.permute.xlu1 %1185  ;;  %v1192_v14 = vpop.permute.xlu0 %1191 }
 0x7c2   : > { %v1205_v10 = vpack.c.bf16 %v1186_v9, %v1186_v9  ;;  %v1207_v15 = vpack.c.bf16 %v1192_v14, %v1192_v14 }
 0x7c4   : > { %2375 = vmatmul.mubr.msk.bf16.vlgmr.msra.gmra.mrb[28].mxu0 %vm402_vm2, %v1205_v10 }
 0x7c5   : > { %2385 = vmatpush3.bf16.xpose.msra.mxu0 %v1354_v11  ;;  %v1189_v12 = vpop.permute.xlu1 %1188  ;;  %2386 = vmatprep.mubr.msk.bf16.mxu0 %vm2667_vm0, %v2666_v0 }
 0x7c6   : > { %v1206_v13 = vpack.c.bf16 %v1189_v12, %v1189_v12  ;;  %2396 = vmatprep.subr.bf16.mxu0 %v2666_v0 }
 0x7c8   : > { %2381 = vmatmul.mubr.msk.bf16.vlgmr.msra.gmra.mrb[36].mxu1 %vm402_vm2, %v1206_v13 }
 0x7c9   : > { %2392 = vmatprep.mubr.msk.bf16.mxu1 %vm2667_vm0, %v2666_v0 }
 0x7cc   : > { %2387 = vmatmul.mubr.msk.bf16.vlgmr.msra.gmra.mrb[32].mxu0 %vm402_vm2, %v1207_v15 }
 0x7cd   : > { %2398 = vmatprep.mubr.msk.bf16.mxu0 %vm2667_vm0, %v2666_v0 }
 0x824   : > { %v1252_v19 = vpop.f32.mrb[32].mxu1 }
 0x825   : > { %v1253_v20 = vadd.f32 %v1252_v19, %v278_v16  ;;  %v2370_v21 = vpop.f32.mrb[33].mxu1  ;;  %v295_v19 = vld [vmem:[#allocation2 + $0x40] sm:$0xf] }
 0x826   : > { %v1255_v18 = vpop.f32.mrb[34].mxu1 }
 0x827   : > { %v2371_v22 = vpop.f32.mrb[35].mxu1  ;;  %v1396_v23 = vsel %vm402_vm2, %v1253_v20, -inf }
 0x828   : > { %1397 = vmax.xlane.f32.xlu1 %v1396_v23  ;;  %v1648_v22 = vsel %vm649_vm3, %v295_v19, 0 }
 0x897   : > { %v1298_v17 = vpop.f32.mrb[28].mxu0 }
 0x898   : > { %v1299_v24 = vadd.f32 %v1298_v17, %v278_v16  ;;  %v2376_v25 = vpop.f32.mrb[29].mxu0  ;;  %v296_v17 = vld [vmem:[#allocation2 + $0x44] sm:$0xf] }
 0x899   : > { %v1301_v26 = vpop.f32.mrb[30].mxu0 }
 0x89a   : > { %v2377_v27 = vpop.f32.mrb[31].mxu0  ;;  %v1399_v28 = vsel %vm402_vm2, %v1299_v24, -inf  ;;  %v1694_v26 = vsel %vm649_vm3, %v296_v17, 0 }
 0x89b   : > { %1400 = vmax.xlane.f32.xlu0 %v1399_v28  ;;  %v1344_v29 = vpop.f32.mrb[36].mxu1  ;;  %v297_v27 = vld [vmem:[#allocation2 + $0x48] sm:$0xf] }
 0x89c   : > { %v1345_v30 = vadd.f32 %v1344_v29, %v278_v16  ;;  %v2382_v31 = vpop.f32.mrb[37].mxu1 }
 0x89d   : > { %v1347_v3 = vpop.f32.mrb[38].mxu1  ;;  %v1740_v31 = vsel %vm649_vm3, %v297_v27, 0 }
 0x89e   : > { %v2383_v32 = vpop.f32.mrb[39].mxu1  ;;  %v1402_v33 = vsel %vm402_vm2, %v1345_v30, -inf }
 0x89f   : > { %v1390_v34 = vpop.f32.mrb[32].mxu0  ;;  %1403 = vmax.xlane.f32.xlu0 %v1402_v33  ;;  %v298_v33 = vld [vmem:[#allocation2 + $0x4c] sm:$0xf] }
 0x8a0   : > { %v1391_v35 = vadd.f32 %v1390_v34, %v278_v16  ;;  %v2388_v36 = vpop.f32.mrb[33].mxu0 }
 0x8a1   : > { %v1393_v37 = vpop.f32.mrb[34].mxu0 }
 0x8a2   : > { %v2389_v38 = vpop.f32.mrb[35].mxu0  ;;  %v1405_v39 = vsel %vm402_vm2, %v1391_v35, -inf  ;;  %v1786_v37 = vsel %vm649_vm3, %v298_v33, 0 }
 0x8a3   : > { %1406 = vmax.xlane.f32.xlu1 %v1405_v39 }
 0x8b4   : > { %1494 = vrot.lane.b32.xlu1 %v2963_v57, %s2671_s15 }
 0x8b5   : > { %1445 = vrot.lane.b32.xlu0 %v2957_v54, %s2671_s15  ;;  %v1398_v40 = vpop.xlane.xlu1 %1397 }
 0x8b6   : > { %v1408_v41 = vsub.f32 %v1253_v20, %v1398_v40 }
 0x8b8   : > { %v1412_v42 = vmul.f32 1.442695, %v1408_v41 }
 0x8ba   : > { %2547 = vpow2.f32 %v1412_v42 }
 0x8c4   : > { %v2548_v43 = vpop.eup %2547 }
 0x8c5   : > { %v1420_v44 = vsel %vm402_vm2, %v2548_v43, 0.0 }
 0x8d4   : > { %1421 = vadd.xlane.f32.xlu0 %v1420_v44 }
 0x928   : > { %v1401_v45 = vpop.xlane.xlu0 %1400 }
 0x929   : > { %v1409_v47 = vsub.f32 %v1299_v24, %v1401_v45 }
 0x92b   : > { %v1414_v48 = vmul.f32 1.442695, %v1409_v47 }
 0x92c   : > { %v1404_v49 = vpop.xlane.xlu0 %1403 }
 0x92d   : > { %2549 = vpow2.f32 %v1414_v48  ;;  %v1410_v50 = vsub.f32 %v1345_v30, %v1404_v49 }
 0x92f   : > { %v1416_v51 = vmul.f32 1.442695, %v1410_v50 }
 0x930   : > { %v1407_v52 = vpop.xlane.xlu1 %1406  ;;  %v1446_v53 = vpop.permute.xlu0 %1445 }
 0x931   : > { %2551 = vpow2.f32 %v1416_v51  ;;  %v1411_v55 = vsub.f32 %v1391_v35, %v1407_v52  ;;  %v1451_v54 = vsel %vm649_vm3, %v1446_v53, 0 }
 0x932   : > { %2391 = vmatpush3.bf16.msra.mxu1 %v1451_v54 }
 0x933   : > { %v1418_v56 = vmul.f32 1.442695, %v1411_v55  ;;  %2402 = vmatprep.subr.bf16.mxu1 %v2666_v0 }
 0x934   : > { %v1495_v57 = vpop.permute.xlu1 %1494 }
 0x935   : > { %2553 = vpow2.f32 %v1418_v56  ;;  %v1500_v58 = vsel %vm649_vm3, %v1495_v57, 0 }
 0x936   : > { %2397 = vmatpush3.bf16.msra.mxu0 %v1500_v58 }
 0x937   : > { %v2550_v59 = vpop.eup %2549  ;;  %2408 = vmatprep.subr.bf16.mxu0 %v2666_v0 }
 0x938   : > { %v1423_v60 = vsel %vm402_vm2, %v2550_v59, 0.0 }
 0x939   : > { %1424 = vadd.xlane.f32.xlu1 %v1423_v60 }
 0x93b   : > { %v2552_v62 = vpop.eup %2551 }
 0x93c   : > { %v1426_v63 = vsel %vm402_vm2, %v2552_v62, 0.0 }
 0x93d   : > { %1427 = vadd.xlane.f32.xlu0 %v1426_v63 }
 0x93f   : > { %v2554_v1 = vpop.eup %2553 }
 0x940   : > { %v1429_v2 = vsel %vm402_vm2, %v2554_v1, 0.0 }
 0x941   : > { %1430 = vadd.xlane.f32.xlu1 %v1429_v2 }
 0x952   : > { %1543 = vrot.lane.b32.xlu1 %v2971_v61, %s2671_s15 }
 0x953   : > { %1592 = vrot.lane.b32.xlu0 %v2982_v8, %s2671_s15  ;;  %s2202_s15 = sshll.u32 %s2725_s22, 7  ;;  %s2673_s22 = smov [#allocation5]  }
 0x954   : > { %s3097_s8 = scalar_lea.hbm %s3145_s5, %s2202_s15  ;;  %s2599_s11 = sshll.u32 %s2673_s22, 4  ;;  %s2600_s11 = int_to_ptr.vmem [resolvable:$false] %s2599_s11 }
 0x955   : > { %s2601_s23 = scalar_lea.vmem %s2600_s11, 256  ;;  %p2602_p3 = scmp.lt.s32.totalorder %s3099_s17, %s2600_s11 }
 0x956   : > { %p2603_p4 = scmp.lt.s32.totalorder %s2601_s23, %s2595_s10 }
 0x958   : > { %p2604_p7 = por %p2603_p4, %p2602_p3 }
 0x95a   : > { %p2605_p8 = pnand %p2604_p7, %p2598_p2 }
 0x961   : > { %v1422_v4 = vpop.xlane.xlu0 %1421 }
 0x962   : > { %2555 = vrcp.f32 %v1422_v4 }
 0x96c   : > { %v2556_v5 = vpop.eup %2555 }
 0x96d   : > { %v1436_v6 = vmul.f32 %v2556_v5, %v2548_v43 }
 0x96f   : > { %v1440_v7 = vpack.c.bf16 %v1436_v6, %v1436_v6 }
 0x971   : > { %2393 = vmatmul.mubr.msk.bf16.vlgmr.msra.gmra.mrb[40].mxu1 %vm402_vm2, %v1440_v7 }
 0x972   : > { %2404 = vmatprep.mubr.msk.bf16.mxu1 %vm2667_vm0, %v2666_v0 }
 0x9c6   : > { %v1425_v9 = vpop.xlane.xlu1 %1424 }
 0x9c7   : > { %2557 = vrcp.f32 %v1425_v9  ;;  %v2186_v9 = vld [vmem:[%s3144_s4 + $0x4] ss:$0 sm:$0xff] }
 0x9ca   : > { %v1428_v10 = vpop.xlane.xlu0 %1427 }
 0x9cb   : > { %2559 = vrcp.f32 %v1428_v10 }
 0x9ce   : > { %v1431_v11 = vpop.xlane.xlu1 %1430  ;;  %v1593_v8 = vpop.permute.xlu0 %1592 }
 0x9cf   : > { %2561 = vrcp.f32 %v1431_v11  ;;  %v1598_v21 = vsel %vm649_vm3, %v1593_v8, 0 }
 0x9d1   : > { %v2558_v61 = vpop.eup %2557 }
 0x9d2   : > { %v1437_v12 = vmul.f32 %v2558_v61, %v2550_v59  ;;  %v1544_v13 = vpop.permute.xlu1 %1543 }
 0x9d3   : > { %v1549_v14 = vsel %vm649_vm3, %v1544_v13, 0 }
 0x9d4   : > { %2403 = vmatpush3.bf16.msra.mxu1 %v1549_v14  ;;  %v1441_v15 = vpack.c.bf16 %v1437_v12, %v1437_v12 }
 0x9d5   : > { %v2560_v16 = vpop.eup %2559  ;;  %2414 = vmatprep.subr.bf16.mxu1 %v2666_v0 }
 0x9d6   : > { %v1438_v20 = vmul.f32 %v2560_v16, %v2552_v62  ;;  %2399 = vmatmul.mubr.msk.bf16.vlgmr.msra.gmra.mrb[36].mxu0 %vm402_vm2, %v1441_v15 }
 0x9d7   : > { %2409 = vmatpush3.bf16.msra.mxu0 %v1598_v21  ;;  %2410 = vmatprep.mubr.msk.bf16.mxu0 %vm2667_vm0, %v2666_v0  ;;  %v2524_v21 = vld [vmem:[#allocation2 + $0x58] sm:$0xff]  }
 0x9d8   : > { %v1442_v18 = vpack.c.bf16 %v1438_v20, %v1438_v20  ;;  %2420 = vmatprep.subr.bf16.mxu0 %v2666_v0  ;;  %v2523_v20 = vld [vmem:[#allocation2 + $0x50] sm:$0xff]  }
 0x9d9   : > { %v2562_v23 = vpop.eup %2561 }
 0x9da   : > { %v1439_v24 = vmul.f32 %v2562_v23, %v2554_v1  ;;  %2405 = vmatmul.mubr.msk.bf16.vlgmr.msra.gmra.mrb[44].mxu1 %vm402_vm2, %v1442_v18  ;;  %v2525_v18 = vld [vmem:[#allocation2 + $0x60] sm:$0xff]  }
 0x9db   : > { %2415 = vmatpush3.bf16.msra.mxu1 %v1648_v22  ;;  %2416 = vmatprep.mubr.msk.bf16.mxu1 %vm2667_vm0, %v2666_v0  ;;  %v2526_v22 = vld [vmem:[#allocation2 + $0x68] sm:$0xff]  }
 0x9dc   : > { %v1443_v25 = vpack.c.bf16 %v1439_v24, %v1439_v24  ;;  %2426 = vmatprep.subr.bf16.mxu1 %v2666_v0 }
 0x9de   : > { %2411 = vmatmul.mubr.msk.bf16.vlgmr.msra.gmra.mrb[40].mxu0 %vm402_vm2, %v1443_v25 }
 0x9df   : > { %2421 = vmatpush3.bf16.msra.mxu0 %v1694_v26  ;;  %2422 = vmatprep.mubr.msk.bf16.mxu0 %vm2667_vm0, %v2666_v0 }
 0x9e0   : > { %2432 = vmatprep.subr.bf16.mxu0 %v2666_v0 }
 0xa44   : > { %v1487_v28 = vpop.f32.mrb[40].mxu1 }
 0xa45   : > { %v1640_v29 = vpack.c.bf16 %v1487_v28, %v1487_v28  ;;  %v2394_v30 = vpop.f32.mrb[41].mxu1 }
 0xa46   : > { %v1490_v3 = vpop.f32.mrb[42].mxu1  ;;  %v2187_v30 = vld [vmem:[%s3144_s4 + $0x9] ss:$0 sm:$0xff] }
 0xa47   : > { %v2395_v32 = vpop.f32.mrb[43].mxu1  ;;  %2417 = vmatmul.mubr.msk.bf16.vlgmr.msra.gmra.mrb[48].mxu1 %vm402_vm2, %v1640_v29  ;;  %v2188_v3 = vld [vmem:[%s3144_s4 + $0xa] ss:$0 sm:$0xff] }
 0xa48   : > { %2427 = vmatpush3.bf16.msra.mxu1 %v1740_v31  ;;  %2428 = vmatprep.mubr.msk.bf16.mxu1 %vm2667_vm0, %v2666_v0 }
 0xa49   : > { %2438 = vmatprep.subr.bf16.mxu1 %v2666_v0 }
 0xaa9   : > { %v1536_v34 = vpop.f32.mrb[36].mxu0 }
 0xaaa   : > { %v1641_v35 = vpack.c.bf16 %v1536_v34, %v1536_v34  ;;  %v2400_v36 = vpop.f32.mrb[37].mxu0 }
 0xaab   : > { %v1539_v38 = vpop.f32.mrb[38].mxu0  ;;  %v2528_v36 = vld [vmem:[#allocation2 + $0x78] sm:$0xff]  }
 0xaac   : > { %v2401_v39 = vpop.f32.mrb[39].mxu0  ;;  %2423 = vmatmul.mubr.msk.bf16.vlgmr.msra.gmra.mrb[44].mxu0 %vm402_vm2, %v1641_v35  ;;  %v2527_v35 = vld [vmem:[#allocation2 + $0x70] sm:$0xff]  }
 0xaad   : > { %v1585_v40 = vpop.f32.mrb[44].mxu1  ;;  %2433 = vmatpush3.bf16.msra.mxu0 %v1786_v37  ;;  %2434 = vmatprep.mubr.msk.bf16.mxu0 %vm2667_vm0, %v2666_v0  ;;  %v2189_v37 = vld [vmem:[%s3144_s4 + $0x5] ss:$0 sm:$0xff] }
 0xaae   : > { %v1642_v41 = vpack.c.bf16 %v1585_v40, %v1585_v40  ;;  %v2406_v42 = vpop.f32.mrb[45].mxu1  ;;  %2446 = vmatprep.subr.bf16.mxu0 %v2666_v0 }
 0xaaf   : > { %v1588_v43 = vpop.f32.mrb[46].mxu1 }
 0xab0   : > { %v2407_v44 = vpop.f32.mrb[47].mxu1  ;;  %2429 = vmatmul.mubr.msk.bf16.vlgmr.msra.gmra.mrb[52].mxu1 %vm402_vm2, %v1642_v41 }
 0xab1   : > { %v1634_v45 = vpop.f32.mrb[40].mxu0  ;;  %2442 = vmatprep.mubr.msk.bf16.mxu1 %vm2667_vm0, %v2666_v0  ;;  %2439 = vmatpush3.bf16.msra.mxu1 %v2523_v20 }
 0xab2   : > { %v1643_v47 = vpack.c.bf16 %v1634_v45, %v1634_v45  ;;  %v2412_v48 = vpop.f32.mrb[41].mxu0  ;;  %2440 = vmatprep.subr.bf16.mxu1 %v2666_v0  ;;  %v2193_v45 = vld [vmem:[%s3144_s4 + $0x6] ss:$0 sm:$0xff] }
 0xab3   : > { %v1637_v49 = vpop.f32.mrb[42].mxu0 }
 0xab4   : > { %v2413_v50 = vpop.f32.mrb[43].mxu0  ;;  %2435 = vmatmul.mubr.msk.bf16.vlgmr.msra.gmra.mrb[48].mxu0 %vm402_vm2, %v1643_v47 }
 0xab5   : > { %2454 = vmatprep.mubr.msk.bf16.mxu0 %vm2667_vm0, %v2666_v0  ;;  %2441 = vmatpush3.bf16.msra.mxu1 %v2524_v21 }
 0xab6   : > { %2447 = vmatpush3.bf16.msra.mxu0 %v2525_v18 }
 0xab7   : > { %2448 = vmatprep.subr.bf16.mxu0 %v2666_v0 }
 0xaba   : > { %2449 = vmatpush3.bf16.msra.mxu0 %v2526_v22 }
 0xabb   : > { %2450 = vmatprep.subr.bf16.mxu0 %v2666_v0 }
 0xabe   : > { %2451 = vmatpush3.bf16.msra.mxu0 %v2527_v35 }
 0xabf   : > { %2452 = vmatprep.subr.bf16.mxu0 %v2666_v0 }
 0xac2   : > { %2453 = vmatpush3.bf16.msra.mxu0 %v2528_v36 }
 0xb1a   : > { %v1684_v51 = vpop.f32.mrb[48].mxu1 }
 0xb1b   : > { %v2418_v52 = vpop.f32.mrb[49].mxu1  ;;  %v1828_v56 = vsel %vm341_vm1, %v1684_v51, 0.0 }
 0xb1c   : > { %v1687_v53 = vpop.f32.mrb[50].mxu1 }
 0xb1d   : > { %v2419_v55 = vpop.f32.mrb[51].mxu1 }
 0xb7f   : > { %v1730_v54 = vpop.f32.mrb[44].mxu0 }
 0xb80   : > { %v1829_v57 = vsel %vm341_vm1, %v1730_v54, 0.0  ;;  %v2424_v58 = vpop.f32.mrb[45].mxu0 }
 0xb81   : > { %v1830_v59 = vadd.f32 %v1829_v57, %v1828_v56  ;;  %v1733_v60 = vpop.f32.mrb[46].mxu0 }
 0xb82   : > { %v2425_v62 = vpop.f32.mrb[47].mxu0 }
 0xb83   : > { %v1776_v63 = vpop.f32.mrb[52].mxu1 }
 0xb84   : > { %v1831_v1 = vsel %vm341_vm1, %v1776_v63, 0.0  ;;  %v2430_v2 = vpop.f32.mrb[53].mxu1 }
 0xb85   : > { %v1832_v4 = vadd.f32 %v1831_v1, %v1830_v59  ;;  %v1779_v5 = vpop.f32.mrb[54].mxu1  ;;  %v2199_v2 = vld [vmem:[%s3144_s4 + $0xb] ss:$0 sm:$0xff] }
 0xb86   : > { %v2431_v6 = vpop.f32.mrb[55].mxu1  ;;  %v2200_v5 = vld [vmem:[%s3144_s4 + $0xc] ss:$0 sm:$0xff] }
 0xb87   : > { %v1822_v7 = vpop.f32.mrb[48].mxu0 }
 0xb88   : > { %v1833_v10 = vsel %vm341_vm1, %v1822_v7, 0.0  ;;  %v2436_v11 = vpop.f32.mrb[49].mxu0 }
 0xb89   : > { %v1834_v61 = vadd.f32 %v1833_v10, %v1832_v4  ;;  %v1825_v12 = vpop.f32.mrb[50].mxu0 }
 0xb8a   : > { %v2437_v13 = vpop.f32.mrb[51].mxu0 }
 0xb8b   : > { %v1839_v8 = vadd.f32 %v2186_v9, %v1834_v61 }
 0xb8d   : > { %v1840_v14 = vadd.f32 %v1839_v8, %v2945_v46 }
 0xb8f   : > { %v1841_v15 = vsel %vm341_vm1, %v1840_v14, 0.0  ;;  %v1845_v16 = vmul.f32 %v1840_v14, %v1840_v14 }
 0xb90   : > { %1842 = vadd.xlane.f32.xlu1 %v1841_v15 }
 0xb91   : > { %v1846_v19 = vsel %vm341_vm1, %v1845_v16, 0.0 }
 0xb92   : > { %1847 = vadd.xlane.f32.xlu0 %v1846_v19 }
 0xc1d   : > { %v1843_v46 = vpop.xlane.xlu1 %1842 }
 0xc1e   : > { %v1844_v23 = vmul.f32 0.03125, %v1843_v46 }
 0xc1f   : > { %v1848_v17 = vpop.xlane.xlu0 %1847 }
 0xc20   : > { %v1850_v24 = vmul.f32 %v1844_v23, %v1844_v23  ;;  %v1849_v25 = vmul.f32 0.03125, %v1848_v17  ;;  %v1852_v28 = vsub.f32 %v1840_v14, %v1844_v23 }
 0xc22   : > { %v1851_v26 = vsub.f32 %v1849_v25, %v1850_v24 }
 0xc24   : > { %v1853_v27 = vadd.f32 1e-05, %v1851_v26 }
 0xc26   : > { %2563 = vrsqrt.f32 %v1853_v27 }
 0xc30   : > { %v2564_v29 = vpop.eup %2563 }
 0xc31   : > { %v1855_v31 = vmul.f32 %v2564_v29, %v1852_v28 }
 0xc33   : > { %v1860_v32 = vmul.f32 %v2187_v30, %v1855_v31 }
 0xc35   : > { %v1865_v33 = vadd.f32 %v2188_v3, %v1860_v32 }
 0xc37   : > { %v1866_v34 = vpack.c.bf16 %v1865_v33, %v1865_v33 }
 0xc39   : > { %2443 = vmatmul.mubr.msk.bf16.vlgmr.msra.gmra.mrb[56].mxu1 %vm341_vm1, %v1866_v34 }
 0xd0c   : > { %v1920_v38 = vpop.f32.mrb[56].mxu1 }
 0xd0d   : > { %v1921_v39 = vadd.f32 %v2189_v37, %v1920_v38  ;;  %v2444_v40 = vpop.f32.mrb[57].mxu1 }
 0xd0e   : > { %v1923_v41 = vpop.f32.mrb[58].mxu1 }
 0xd0f   : > { %v1926_v42 = vmax.f32 %v1921_v39, 0.0  ;;  %v2445_v43 = vpop.f32.mrb[59].mxu1 }
 0xd11   : > { %v1927_v44 = vpack.c.bf16 %v1926_v42, %v1926_v42 }
 0xd13   : > { %2455 = vmatmul.mubr.msk.bf16.vlgmr.msra.gmra.mrb[52].mxu0 %vm1956_vm4, %v1927_v44 }
 0xde6   : > { %v1994_v0 = vpop.f32.mrb[52].mxu0 }
 0xde7   : > { %v1995_v47 = vadd.f32 %v2193_v45, %v1994_v0  ;;  %v2456_v48 = vpop.f32.mrb[53].mxu0 }
 0xde8   : > { %v1997_v49 = vpop.f32.mrb[54].mxu0 }
 0xde9   : > { %v2000_v50 = vadd.f32 %v1995_v47, %v1865_v33  ;;  %v2457_v51 = vpop.f32.mrb[55].mxu0 }
 0xdeb   : > { %v2001_v52 = vsel %vm341_vm1, %v2000_v50, 0.0  ;;  %v2005_v53 = vmul.f32 %v2000_v50, %v2000_v50 }
 0xdec   : > { %2002 = vadd.xlane.f32.xlu0 %v2001_v52 }
 0xded   : > { %v2006_v55 = vsel %vm341_vm1, %v2005_v53, 0.0 }
 0xdee   : > { %2007 = vadd.xlane.f32.xlu1 %v2006_v55 }
 0xe79   : > { %v2003_v54 = vpop.xlane.xlu0 %2002 }
 0xe7a   : > { %v2004_v56 = vmul.f32 0.03125, %v2003_v54 }
 0xe7b   : > { %v2008_v57 = vpop.xlane.xlu1 %2007 }
 0xe7c   : > { %v2010_v58 = vmul.f32 %v2004_v56, %v2004_v56  ;;  %v2009_v59 = vmul.f32 0.03125, %v2008_v57  ;;  %v2012_v63 = vsub.f32 %v2000_v50, %v2004_v56 }
 0xe7e   : > { %v2011_v60 = vsub.f32 %v2009_v59, %v2010_v58 }
 0xe80   : > { %v2013_v62 = vadd.f32 1e-05, %v2011_v60 }
 0xe82   : > { %2565 = vrsqrt.f32 %v2013_v62 }
 0xe8c   : > { %v2566_v1 = vpop.eup %2565 }
 0xe8d   : > { %v2015_v4 = vmul.f32 %v2566_v1, %v2012_v63 }
 0xe8f   : > { %v2020_v6 = vmul.f32 %v2199_v2, %v2015_v4 }
 0xe91   : > { %v2025_v7 = vadd.f32 %v2200_v5, %v2020_v6 }
 0xe93   : > { %2026 = vst.msk [vmem:[%s259_s16] sm:$0xff] %vm341_vm1, %v2025_v7 }
 0xe94   : > { %2608 = shalt.err (!%p2605_p8)
}
 0xe95   : > { %s2609_s25 = scalar_lea.hbm %s3097_s8, 128  ;;  %s2613_s12 = scalar_lea.hbm %s3145_s5, 256 }
 0xe96   : > { %p2610_p11 = scmp.ne.s32.totalorder %s3097_s8, %s2609_s25  ;;  %p2614_p0 = scmp.lt.u32.totalorder %s3097_s8, %s3145_s5 }
 0xe97   : > { %p2615_p5 = scmp.lt.u32.totalorder %s2613_s12, %s2609_s25  ;;  %p2617_p9 = scmp.lt.u32.totalorder %s2609_s25, %s3097_s8 }
 0xe98   : > { %p2611_p13 = pnand %p2610_p11, %p3156_p10 }
 0xe99   : > { %p2616_p6 = por %p2615_p5, %p2614_p0 }
 0xe9a   : > { %p2612_p1 = pneg %p2611_p13 }
 0xe9b   : > { %p2618_p12 = por %p2617_p9, %p2616_p6 }
 0xe9d   : > { %p2619_p2 = pnand %p2618_p12, %p2612_p1 }
 0xe9f   : > { %2622 = shalt.err (!%p2619_p2)
}
 0xea0   : > { %2462 = dma.vmem_to_hbm [thread:$0]  (%p3156_p10), %s3099_s17, 128, %s3097_s8, %s2028_s9  }
 0xea1 PF: > { %p2474_p3 = scmp.ge.s32.totalorder %s2661_s21, 2  ;;  %s2053_s15 = sand.u32 1, %s2649_s18  }
 0xea2   : > { %p3157_p4 = scmp.ne.s32.totalorder %s3150_s29, 0  ;;  %s2054_s16 = scalar_lea.sflag [#allocation4], %s2053_s15 }
 0xea4   : > { %p2469_p7 = pnand %p2474_p3, %p3157_p4 }
 0xea6   : > { %2644 = dma.done.wait (!%p2469_p7), %s2054_s16, 128  }
 0xea7   : > { %2646 = vsyncadd (!%p2469_p7), %s2054_s16, 4294967168  ;;  %p16_p8 = scmp.ge.s32.totalorder %s2729_s24, 4   ;;  %s3158_s18 = smov %s2653_s19 }
 0xea8   : > { %s3159_s19 = smov %s2657_s20  ;;  %s3160_s20 = smov %s2740_s27 }
 0xea9   : > { %s3161_s21 = smov %s2729_s24  ;;  %18 = sbr.rel (!%p16_p8) target bundleno = 4 (0x4), region = 86 }
 0xeb0   :  { %2059 = vsyncpa [#allocation3], 1 }
 0xeb1   :  { %2061 = vsyncpa [#allocation3 + $0x1], 1 }
 0xeb2   :  { %2062 = vsyncpa [#allocation4], 1 }
 0xeb3   :  { %2064 = vsyncpa [#allocation4 + $0x1], 1 }

</bundles_post_ra>
